<compile_context>
chip_gen: v5e
topology: v5e:2x2
jax: 0.10.0
libtpu: 0.0.40
codegen_flags: <defaults>
</compile_context>

<pallas_src>
import functools
import math

import jax
import jax.numpy as jnp
from jax.experimental import pallas as pl
from jax.experimental.pallas import tpu as pltpu


# ---------------------------------------------------------------------------
# Fused STE-block kernel:
#   norm1 -> fused-QKV multi-head self-attention -> +residual
#   norm2 -> fc1 -> exact GELU -> fc2  -> +residual
#   Spatial_norm
# (all Dropout / DropPath layers are identity in inference; dpr[0] == 0)
# ---------------------------------------------------------------------------
def ste_block_kernel(
    x_ref,        # (tb, n, c)     input tile (tb whole sequences)
    vec_ref,      # (8, c)   f32   packed: ln1_g,ln1_b,bp,ln2_g,ln2_b,b2,lns_g,lns_b
    wqkv_ref,     # (c, 3c)  bf16  fused QKV weight (q-columns pre-scaled)
    bqkv_ref,     # (1, 3c)  f32   fused QKV bias   (q-part    pre-scaled)
    wp_ref,       # (c, c)   bf16  attention output projection
    w1_ref,       # (c, hid) bf16  Mlp fc1
    b1_ref,       # (1, hid) f32
    w2_ref,       # (hid, c) bf16  Mlp fc2
    o_ref,        # (tb, n, c)
    *, num_heads, eps,
):
    tb, n, c = x_ref.shape
    hd = c // num_heads
    rows = tb * n
    cdt = wqkv_ref.dtype                       # MXU operand dtype (bf16)

    vecs = vec_ref[...]
    ln1_g, ln1_b = vecs[0:1], vecs[1:2]
    bp = vecs[2:3]
    ln2_g, ln2_b = vecs[3:4], vecs[4:5]
    b2 = vecs[5:6]
    lns_g, lns_b = vecs[6:7], vecs[7:8]

    def layernorm(v, g, b):
        # torch.nn.LayerNorm semantics (biased variance), computed in f32.
        mu = jnp.mean(v, axis=-1, keepdims=True)
        d = v - mu
        var = jnp.mean(d * d, axis=-1, keepdims=True)
        return d * jax.lax.rsqrt(var + eps) * g + b

    def mxu(a, w_ref):
        # bf16 operands on the MXU, f32 accumulation.
        return jnp.dot(a.astype(w_ref.dtype), w_ref[...],
                       preferred_element_type=jnp.float32)

    # Residual stream carried in f32 (n=8 matches the f32 sublane tile).
    x2 = x_ref[...].reshape(rows, c).astype(jnp.float32)

    # ---------------- norm1 + fused-QKV attention + residual ----------------
    xn1 = layernorm(x2, ln1_g, ln1_b)
    qkv = (mxu(xn1, wqkv_ref) + bqkv_ref[...]).reshape(tb, n, 3 * c)

    wp = wp_ref[...]
    attn_out = jnp.zeros((rows, c), jnp.float32)
    for h in range(num_heads):                 # static unroll over heads
        lo = h * hd
        qh = qkv[:, :, lo:lo + hd].astype(cdt)
        kh = qkv[:, :, c + lo:c + lo + hd].astype(cdt)
        vh = qkv[:, :, 2 * c + lo:2 * c + lo + hd].astype(cdt)
        # attention scale already folded into the q-columns of wqkv
        s = jnp.einsum("bqd,bkd->bqk", qh, kh,
                       preferred_element_type=jnp.float32)
        s = s - jnp.max(s, axis=-1, keepdims=True)
        p = jnp.exp(s)
        # softmax normalisation folded onto the small (tb,n,hd) head output,
        # using the EUP reciprocal (free slot) instead of a VPU divide.
        inv = pl.reciprocal(jnp.sum(p, axis=-1, keepdims=True), approx=True)
        oh = jnp.einsum("bqk,bkd->bqd", p.astype(cdt), vh,
                        preferred_element_type=jnp.float32)
        oh = (oh * inv).reshape(rows, hd)
        # concat_h(oh) @ Wp == sum_h oh @ Wp[h*hd:(h+1)*hd, :]   (exact)
        attn_out = attn_out + jnp.dot(oh.astype(cdt), wp[lo:lo + hd, :],
                                      preferred_element_type=jnp.float32)
    x2 = x2 + attn_out + bp

    # ---------------- norm2 + Mlp (fc1 -> exact GELU -> fc2) + residual -----
    xn2 = layernorm(x2, ln2_g, ln2_b)
    hmid = mxu(xn2, w1_ref) + b1_ref[...]
    # exact (erf) GELU in f32, matching torch.nn.GELU default
    hmid = 0.5 * hmid * (1.0 + jax.lax.erf(hmid * (1.0 / math.sqrt(2.0))))
    x2 = x2 + mxu(hmid, w2_ref) + b2

    # ---------------- Spatial_norm ------------------------------------------
    out = layernorm(x2, lns_g, lns_b)
    o_ref[...] = out.reshape(tb, n, c).astype(o_ref.dtype)


# ---------------------------------------------------------------------------
# One-time parameter preparation (do NOT do this per forward call)
# ---------------------------------------------------------------------------
def prepare_params(raw, *, num_heads, compute_dtype=jnp.bfloat16):
    """Torch-layout params (Linear weights are (out,in), vectors are 1-D) ->
    kernel layout: weights transposed to (in,out) and cast to the MXU operand
    dtype, QKV fused (with the attention scale folded into the q columns),
    all small LayerNorm/bias vectors packed into one (8, c) f32 array."""
    c = raw["proj_w"].shape[0]
    hd = c // num_heads
    scale = hd ** -0.5

    wqkv = jnp.asarray(raw["qkv_w"], jnp.float32).T          # (c, 3c)
    bqkv = jnp.asarray(raw["qkv_b"], jnp.float32)            # (3c,)
    q_scale = jnp.concatenate([jnp.full((c,), scale, jnp.float32),
                               jnp.ones((2 * c,), jnp.float32)])
    wqkv = wqkv * q_scale[None, :]
    bqkv = bqkv * q_scale

    vecs = jnp.stack([
        raw["norm1_w"], raw["norm1_b"],
        raw["proj_b"],
        raw["norm2_w"], raw["norm2_b"],
        raw["fc2_b"],
        raw["snorm_w"], raw["snorm_b"],
    ]).astype(jnp.float32)                                   # (8, c)

    return dict(
        vecs=vecs,
        wqkv=wqkv.astype(compute_dtype),
        bqkv=bqkv.reshape(1, -1).astype(jnp.float32),
        wp=jnp.asarray(raw["proj_w"], jnp.float32).T.astype(compute_dtype),
        w1=jnp.asarray(raw["fc1_w"], jnp.float32).T.astype(compute_dtype),
        b1=jnp.asarray(raw["fc1_b"], jnp.float32).reshape(1, -1),
        w2=jnp.asarray(raw["fc2_w"], jnp.float32).T.astype(compute_dtype),
    )


# ---------------------------------------------------------------------------
# VMEM budgeting helpers (padded tile shapes)
# ---------------------------------------------------------------------------
def _vmem_capacity_bytes():
    try:
        return int(pltpu.get_tpu_info().vmem_capacity_bytes)
    except Exception:
        return 64 * 2 ** 20          # conservative (v7x-sized) default


def _padded_bytes(shape, dtype):
    dt = jnp.dtype(dtype)
    sublane = max(1, 32 // dt.itemsize)      # 8 for f32, 16 for bf16
    dims = list(shape)
    dims[-1] = pl.cdiv(dims[-1], 128) * 128
    if len(dims) >= 2:
        dims[-2] = pl.cdiv(dims[-2], sublane) * sublane
    total = 1
    for d in dims:
        total *= d
    return total * dt.itemsize


# ---------------------------------------------------------------------------
# Wrapper (lazy / jit-able; no host syncs inside)
# ---------------------------------------------------------------------------
def ste_pallas(x, params, *, num_heads, eps=1e-6):
    """STE forward (inference mode). x: (b, f, n, c); params: prepare_params()."""
    b, f, n, c = x.shape
    bf = b * f
    assert c % num_heads == 0, "dim must be divisible by num_heads"
    hid = params["w1"].shape[1]

    xs = x.reshape(bf, n, c)

    weight_args = [params["vecs"], params["wqkv"], params["bqkv"],
                   params["wp"], params["w1"], params["b1"], params["w2"]]

    # ---- per-generation VMEM budget (from padded shapes) --------------------
    phys_vmem = _vmem_capacity_bytes()
    small_vmem = phys_vmem <= 64 * 2 ** 20            # v7x-class: 64 MiB / TC
    vmem_cap = (48 << 20) if small_vmem else (112 << 20)

    w_bytes = 2 * sum(_padded_bytes(a.shape, a.dtype) for a in weight_args)

    def footprint(tb):
        rows = tb * n
        io = 2 * 2 * _padded_bytes((tb, n, c), xs.dtype)       # in+out, 2 buffers
        act = (6 * _padded_bytes((rows, c), jnp.float32)
               + 2 * _padded_bytes((rows, 3 * c), jnp.float32)
               + 2 * _padded_bytes((tb, n, n), jnp.float32)
               + 4 * _padded_bytes((tb, n, c // num_heads), jnp.float32)
               + 2 * _padded_bytes((rows, hid), jnp.float32))
        return io + w_bytes + act

    # Row tile = tb whole sequences per grid step; bigger tiles amortize the
    # ~0.35us per-step overhead, so take the largest that fits the budget.
    target_rows = 512 if small_vmem else 1024
    tb = max(1, min(bf, pl.cdiv(target_rows, n)))
    while tb > 1 and footprint(tb) > (vmem_cap * 3) // 5:
        tb = max(1, tb // 2)

    # Megacore split only on v7x-class chips (2 TCs share the parallel axis);
    # prefer an even step count so the tail step doesn't idle one core.
    if small_vmem and tb > 1:
        steps = pl.cdiv(bf, tb)
        if steps == 1:
            tb = pl.cdiv(tb, 2)
        elif steps % 2 == 1:
            tb = max(1, pl.cdiv(bf, steps + 1))

    bf_pad = pl.cdiv(bf, tb) * tb
    if bf_pad != bf:
        xs = jnp.pad(xs, ((0, bf_pad - bf), (0, 0), (0, 0)))
    grid = (bf_pad // tb,)

    vmem_limit = int(min(vmem_cap, max(32 << 20, 2 * footprint(tb))))

    kernel = functools.partial(ste_block_kernel, num_heads=num_heads, eps=eps)

    x_spec = pl.BlockSpec((tb, n, c), lambda i: (i, 0, 0))
    out_spec = pl.BlockSpec((tb, n, c), lambda i: (i, 0, 0))
    w_specs = [pl.BlockSpec(a.shape, lambda i: (0, 0)) for a in weight_args]

    out = pl.pallas_call(
        kernel,
        out_shape=jax.ShapeDtypeStruct((bf_pad, n, c), x.dtype),
        grid=grid,
        in_specs=[x_spec] + w_specs,
        out_specs=out_spec,
        compiler_params=pltpu.CompilerParams(
            dimension_semantics=("parallel",),
            vmem_limit_bytes=vmem_limit),
    )(xs, *weight_args)

    return out[:bf].reshape(b, f, n, c)


# ---------------------------------------------------------------------------
# Pure-JAX reference: faithful transcription of the PyTorch forward (f32)
# ---------------------------------------------------------------------------
def ste_reference(x, raw, *, num_heads, eps=1e-6):
    b, f, n, c = x.shape
    hd = c // num_heads
    scale = hd ** -0.5
    xs = x.reshape(b * f, n, c)

    def ln(v, w, bias):
        mu = jnp.mean(v, axis=-1, keepdims=True)
        var = jnp.mean((v - mu) ** 2, axis=-1, keepdims=True)
        return (v - mu) / jnp.sqrt(var + eps) * w + bias

    # x = x + Attn(norm1(x))
    h = ln(xs, raw["norm1_w"], raw["norm1_b"])
    qkv = h @ raw["qkv_w"].T + raw["qkv_b"]
    qkv = jnp.transpose(qkv.reshape(b * f, n, 3, num_heads, hd), (2, 0, 3, 1, 4))
    q, k, v = qkv[0], qkv[1], qkv[2]                       # (bf, H, n, hd)
    attn = jax.nn.softmax((q @ jnp.swapaxes(k, -2, -1)) * scale, axis=-1)
    av = jnp.swapaxes(attn @ v, 1, 2).reshape(b * f, n, c)
    xs = xs + (av @ raw["proj_w"].T + raw["proj_b"])

    # x = x + Mlp(norm2(x))
    h = ln(xs, raw["norm2_w"], raw["norm2_b"])
    h = h @ raw["fc1_w"].T + raw["fc1_b"]
    h = 0.5 * h * (1.0 + jax.lax.erf(h / math.sqrt(2.0)))
    xs = xs + (h @ raw["fc2_w"].T + raw["fc2_b"])

    # Spatial_norm
    xs = ln(xs, raw["snorm_w"], raw["snorm_b"])
    return xs.reshape(b, f, n, c)


# TODO(synk): train-mode Dropout / DropPath (stochastic masking) not
# implemented; this forward matches inference / drop_rate=0 semantics.

if __name__ == "__main__":
    # Small shapes consistent with STE: b frames-batch, f frames, n joints,
    # c = embed_dim_ratio, mlp_ratio=2 -> hidden=64, num_heads=4 (head_dim=8).
    b, f, n, c = 2, 4, 8, 32
    num_heads = 4
    hid = int(c * 2.0)
    eps = 1e-6

    key = jax.random.PRNGKey(0)
    ks = jax.random.split(key, 16)

    def unif(k, shape, bound):
        return jax.random.uniform(k, shape, jnp.float32, -bound, bound)

    x = jax.random.normal(ks[0], (b, f, n, c), dtype=jnp.float32)

    bc = 1.0 / math.sqrt(c)
    bh = 1.0 / math.sqrt(hid)
    raw = {  # torch-layout parameters (Linear weights are (out, in))
        "norm1_w": 1.0 + 0.1 * jax.random.normal(ks[1], (c,)),
        "norm1_b": 0.1 * jax.random.normal(ks[2], (c,)),
        "qkv_w": unif(ks[3], (3 * c, c), bc),
        "qkv_b": unif(ks[4], (3 * c,), bc),
        "proj_w": unif(ks[5], (c, c), bc),
        "proj_b": unif(ks[6], (c,), bc),
        "norm2_w": 1.0 + 0.1 * jax.random.normal(ks[7], (c,)),
        "norm2_b": 0.1 * jax.random.normal(ks[8], (c,)),
        "fc1_w": unif(ks[9], (hid, c), bc),
        "fc1_b": unif(ks[10], (hid,), bc),
        "fc2_w": unif(ks[11], (c, hid), bh),
        "fc2_b": unif(ks[12], (c,), bh),
        "snorm_w": 1.0 + 0.1 * jax.random.normal(ks[13], (c,)),
        "snorm_b": 0.1 * jax.random.normal(ks[14], (c,)),
    }

    # One-time layout preparation (transposes / fusing / bf16 cast happen here).
    params = prepare_params(raw, num_heads=num_heads)

    fwd = jax.jit(functools.partial(ste_pallas, num_heads=num_heads, eps=eps))
    y = jax.block_until_ready(fwd(x, params))

    y_ref = ste_reference(x, raw, num_heads=num_heads, eps=eps)
    assert y.shape == (b, f, n, c)
    max_err = float(jnp.max(jnp.abs(y - y_ref)))
    # bf16 MXU operands/weights (f32 accumulation) vs. the f32 torch-semantics
    # reference -> tolerance relaxed accordingly.
    assert jnp.allclose(y, y_ref, atol=5e-2, rtol=5e-2), (
        f"mismatch vs reference, max abs err = {max_err}")

    print("KERNEL_OK")
</pallas_src>

<mosaic_0001>
module attributes {stable_mosaic.version = 11 : i64} {
  func.func @ste_block_kernel(%arg0: i32, %arg1: memref<4x8x32xf32, #tpu.memory_space<vmem>>, %arg2: memref<8x32xf32, #tpu.memory_space<vmem>>, %arg3: memref<32x96xbf16, #tpu.memory_space<vmem>>, %arg4: memref<1x96xf32, #tpu.memory_space<vmem>>, %arg5: memref<32x32xbf16, #tpu.memory_space<vmem>>, %arg6: memref<32x64xbf16, #tpu.memory_space<vmem>>, %arg7: memref<1x64xf32, #tpu.memory_space<vmem>>, %arg8: memref<64x32xbf16, #tpu.memory_space<vmem>>, %arg9: memref<4x8x32xf32, #tpu.memory_space<vmem>>) attributes {dimension_semantics = [#tpu.dimension_semantics<parallel>], iteration_bounds = array<i64: 2>, scalar_prefetch = 0 : i64, scratch_operands = 0 : i64, tpu.core_type = #tpu.core_type<tc>, window_params = [{transform_indices = @transform_0, window_bounds = array<i64: 4, 8, 32>}, {pipeline_mode = #tpu.pipeline_mode<synchronous>, transform_indices = @transform_1, window_bounds = array<i64: 8, 32>}, {pipeline_mode = #tpu.pipeline_mode<synchronous>, transform_indices = @transform_2, window_bounds = array<i64: 32, 96>}, {pipeline_mode = #tpu.pipeline_mode<synchronous>, transform_indices = @transform_3, window_bounds = array<i64: 1, 96>}, {pipeline_mode = #tpu.pipeline_mode<synchronous>, transform_indices = @transform_4, window_bounds = array<i64: 32, 32>}, {pipeline_mode = #tpu.pipeline_mode<synchronous>, transform_indices = @transform_5, window_bounds = array<i64: 32, 64>}, {pipeline_mode = #tpu.pipeline_mode<synchronous>, transform_indices = @transform_6, window_bounds = array<i64: 1, 64>}, {pipeline_mode = #tpu.pipeline_mode<synchronous>, transform_indices = @transform_7, window_bounds = array<i64: 64, 32>}, {transform_indices = @transform_8, window_bounds = array<i64: 4, 8, 32>}]} {
    %c0 = arith.constant 0 : index
    %c0_0 = arith.constant 0 : index
    %0 = vector.load %arg2[%c0, %c0_0] : memref<8x32xf32, #tpu.memory_space<vmem>>, vector<8x32xf32>
    %1 = vector.extract_strided_slice %0 {offsets = [0, 0], sizes = [1, 32], strides = [1, 1]} : vector<8x32xf32> to vector<1x32xf32>
    %2 = vector.extract_strided_slice %0 {offsets = [1, 0], sizes = [1, 32], strides = [1, 1]} : vector<8x32xf32> to vector<1x32xf32>
    %3 = vector.extract_strided_slice %0 {offsets = [2, 0], sizes = [1, 32], strides = [1, 1]} : vector<8x32xf32> to vector<1x32xf32>
    %4 = vector.extract_strided_slice %0 {offsets = [3, 0], sizes = [1, 32], strides = [1, 1]} : vector<8x32xf32> to vector<1x32xf32>
    %5 = vector.extract_strided_slice %0 {offsets = [4, 0], sizes = [1, 32], strides = [1, 1]} : vector<8x32xf32> to vector<1x32xf32>
    %6 = vector.extract_strided_slice %0 {offsets = [5, 0], sizes = [1, 32], strides = [1, 1]} : vector<8x32xf32> to vector<1x32xf32>
    %7 = vector.extract_strided_slice %0 {offsets = [6, 0], sizes = [1, 32], strides = [1, 1]} : vector<8x32xf32> to vector<1x32xf32>
    %8 = vector.extract_strided_slice %0 {offsets = [7, 0], sizes = [1, 32], strides = [1, 1]} : vector<8x32xf32> to vector<1x32xf32>
    %c0_1 = arith.constant 0 : index
    %c0_2 = arith.constant 0 : index
    %c0_3 = arith.constant 0 : index
    %9 = vector.load %arg1[%c0_1, %c0_2, %c0_3] : memref<4x8x32xf32, #tpu.memory_space<vmem>>, vector<4x8x32xf32>
    %10 = vector.shape_cast %9 : vector<4x8x32xf32> to vector<32x32xf32>
    %cst = arith.constant dense<0.000000e+00> : vector<32xf32>
    %11 = vector.multi_reduction <add>, %10, %cst [1] : vector<32x32xf32> to vector<32xf32>
    %12 = vector.shape_cast %11 : vector<32xf32> to vector<32x1xf32>
    %cst_4 = arith.constant 3.200000e+01 : f32
    %13 = vector.broadcast %cst_4 : f32 to vector<32x1xf32>
    %14 = arith.divf %12, %13 : vector<32x1xf32>
    %15 = vector.broadcast %14 : vector<32x1xf32> to vector<32x32xf32>
    %16 = arith.subf %10, %15 : vector<32x32xf32>
    %17 = arith.mulf %16, %16 : vector<32x32xf32>
    %cst_5 = arith.constant dense<0.000000e+00> : vector<32xf32>
    %18 = vector.multi_reduction <add>, %17, %cst_5 [1] : vector<32x32xf32> to vector<32xf32>
    %19 = vector.shape_cast %18 : vector<32xf32> to vector<32x1xf32>
    %cst_6 = arith.constant 3.200000e+01 : f32
    %20 = vector.broadcast %cst_6 : f32 to vector<32x1xf32>
    %21 = arith.divf %19, %20 : vector<32x1xf32>
    %cst_7 = arith.constant 9.99999997E-7 : f32
    %22 = vector.broadcast %cst_7 : f32 to vector<32x1xf32>
    %23 = arith.addf %21, %22 : vector<32x1xf32>
    %24 = math.rsqrt %23 : vector<32x1xf32>
    %25 = vector.broadcast %24 : vector<32x1xf32> to vector<32x32xf32>
    %26 = arith.mulf %16, %25 : vector<32x32xf32>
    %27 = vector.broadcast %1 : vector<1x32xf32> to vector<32x32xf32>
    %28 = arith.mulf %26, %27 : vector<32x32xf32>
    %29 = vector.broadcast %2 : vector<1x32xf32> to vector<32x32xf32>
    %30 = arith.addf %28, %29 : vector<32x32xf32>
    %31 = arith.truncf %30 : vector<32x32xf32> to vector<32x32xbf16>
    %c0_8 = arith.constant 0 : index
    %c0_9 = arith.constant 0 : index
    %32 = vector.load %arg3[%c0_8, %c0_9] : memref<32x96xbf16, #tpu.memory_space<vmem>>, vector<32x96xbf16>
    %cst_10 = arith.constant dense<0.000000e+00> : vector<32x96xf32>
    %33 = tpu.matmul %31, %32, %cst_10 {dimension_numbers = #tpu.dot_dimension_numbers<[1], [0], [0], [1], [0, 0, 1, 1], [], []>} : vector<32x32xbf16>, vector<32x96xbf16>, vector<32x96xf32> -> vector<32x96xf32>
    %c0_11 = arith.constant 0 : index
    %c0_12 = arith.constant 0 : index
    %34 = vector.load %arg4[%c0_11, %c0_12] : memref<1x96xf32, #tpu.memory_space<vmem>>, vector<1x96xf32>
    %35 = vector.broadcast %34 : vector<1x96xf32> to vector<32x96xf32>
    %36 = arith.addf %33, %35 : vector<32x96xf32>
    %37 = vector.shape_cast %36 : vector<32x96xf32> to vector<4x8x96xf32>
    %c0_13 = arith.constant 0 : index
    %c0_14 = arith.constant 0 : index
    %38 = vector.load %arg5[%c0_13, %c0_14] : memref<32x32xbf16, #tpu.memory_space<vmem>>, vector<32x32xbf16>
    %cst_15 = arith.constant 0.000000e+00 : f32
    %39 = vector.broadcast %cst_15 : f32 to vector<32x32xf32>
    %40 = vector.extract_strided_slice %37 {offsets = [0, 0, 0], sizes = [4, 8, 8], strides = [1, 1, 1]} : vector<4x8x96xf32> to vector<4x8x8xf32>
    %41 = arith.truncf %40 : vector<4x8x8xf32> to vector<4x8x8xbf16>
    %42 = vector.extract_strided_slice %37 {offsets = [0, 0, 32], sizes = [4, 8, 8], strides = [1, 1, 1]} : vector<4x8x96xf32> to vector<4x8x8xf32>
    %43 = arith.truncf %42 : vector<4x8x8xf32> to vector<4x8x8xbf16>
    %44 = vector.extract_strided_slice %37 {offsets = [0, 0, 64], sizes = [4, 8, 8], strides = [1, 1, 1]} : vector<4x8x96xf32> to vector<4x8x8xf32>
    %45 = arith.truncf %44 : vector<4x8x8xf32> to vector<4x8x8xbf16>
    "tpu.trace_start"() <{level = 10 : i32, message = "bqd,bkd->bqk"}> : () -> ()
    %cst_16 = arith.constant dense<0.000000e+00> : vector<4x8x8xf32>
    %46 = tpu.matmul %41, %43, %cst_16 {dimension_numbers = #tpu.dot_dimension_numbers<[2], [2], [1], [1], [0, 0, 0, 1, 1, 1], [0], [0]>} : vector<4x8x8xbf16>, vector<4x8x8xbf16>, vector<4x8x8xf32> -> vector<4x8x8xf32>
    "tpu.trace_stop"() : () -> ()
    %cst_17 = arith.constant dense<0xFF800000> : vector<4x8xf32>
    %47 = vector.multi_reduction <maximumf>, %46, %cst_17 [2] : vector<4x8x8xf32> to vector<4x8xf32>
    %48 = vector.shape_cast %47 : vector<4x8xf32> to vector<4x8x1xf32>
    %49 = vector.broadcast %48 : vector<4x8x1xf32> to vector<4x8x8xf32>
    %50 = arith.subf %46, %49 : vector<4x8x8xf32>
    %51 = math.exp %50 : vector<4x8x8xf32>
    %cst_18 = arith.constant dense<0.000000e+00> : vector<4x8xf32>
    %52 = vector.multi_reduction <add>, %51, %cst_18 [2] : vector<4x8x8xf32> to vector<4x8xf32>
    %53 = vector.shape_cast %52 : vector<4x8xf32> to vector<4x8x1xf32>
    %54 = tpu.reciprocal %53 {approx = true} : vector<4x8x1xf32> -> vector<4x8x1xf32>
    %55 = arith.truncf %51 : vector<4x8x8xf32> to vector<4x8x8xbf16>
    "tpu.trace_start"() <{level = 10 : i32, message = "bqk,bkd->bqd"}> : () -> ()
    %cst_19 = arith.constant dense<0.000000e+00> : vector<4x8x8xf32>
    %56 = tpu.matmul %55, %45, %cst_19 {dimension_numbers = #tpu.dot_dimension_numbers<[2], [1], [1], [2], [0, 0, 0, 1, 1, 2], [0], [0]>} : vector<4x8x8xbf16>, vector<4x8x8xbf16>, vector<4x8x8xf32> -> vector<4x8x8xf32>
    "tpu.trace_stop"() : () -> ()
    %57 = vector.broadcast %54 : vector<4x8x1xf32> to vector<4x8x8xf32>
    %58 = arith.mulf %56, %57 : vector<4x8x8xf32>
    %59 = vector.shape_cast %58 : vector<4x8x8xf32> to vector<32x8xf32>
    %60 = arith.truncf %59 : vector<32x8xf32> to vector<32x8xbf16>
    %61 = vector.extract_strided_slice %38 {offsets = [0, 0], sizes = [8, 32], strides = [1, 1]} : vector<32x32xbf16> to vector<8x32xbf16>
    %cst_20 = arith.constant dense<0.000000e+00> : vector<32x32xf32>
    %62 = tpu.matmul %60, %61, %cst_20 {dimension_numbers = #tpu.dot_dimension_numbers<[1], [0], [0], [1], [0, 0, 1, 1], [], []>} : vector<32x8xbf16>, vector<8x32xbf16>, vector<32x32xf32> -> vector<32x32xf32>
    %63 = arith.addf %39, %62 : vector<32x32xf32>
    %64 = vector.extract_strided_slice %37 {offsets = [0, 0, 8], sizes = [4, 8, 8], strides = [1, 1, 1]} : vector<4x8x96xf32> to vector<4x8x8xf32>
    %65 = arith.truncf %64 : vector<4x8x8xf32> to vector<4x8x8xbf16>
    %66 = vector.extract_strided_slice %37 {offsets = [0, 0, 40], sizes = [4, 8, 8], strides = [1, 1, 1]} : vector<4x8x96xf32> to vector<4x8x8xf32>
    %67 = arith.truncf %66 : vector<4x8x8xf32> to vector<4x8x8xbf16>
    %68 = vector.extract_strided_slice %37 {offsets = [0, 0, 72], sizes = [4, 8, 8], strides = [1, 1, 1]} : vector<4x8x96xf32> to vector<4x8x8xf32>
    %69 = arith.truncf %68 : vector<4x8x8xf32> to vector<4x8x8xbf16>
    "tpu.trace_start"() <{level = 10 : i32, message = "bqd,bkd->bqk"}> : () -> ()
    %cst_21 = arith.constant dense<0.000000e+00> : vector<4x8x8xf32>
    %70 = tpu.matmul %65, %67, %cst_21 {dimension_numbers = #tpu.dot_dimension_numbers<[2], [2], [1], [1], [0, 0, 0, 1, 1, 1], [0], [0]>} : vector<4x8x8xbf16>, vector<4x8x8xbf16>, vector<4x8x8xf32> -> vector<4x8x8xf32>
    "tpu.trace_stop"() : () -> ()
    %cst_22 = arith.constant dense<0xFF800000> : vector<4x8xf32>
    %71 = vector.multi_reduction <maximumf>, %70, %cst_22 [2] : vector<4x8x8xf32> to vector<4x8xf32>
    %72 = vector.shape_cast %71 : vector<4x8xf32> to vector<4x8x1xf32>
    %73 = vector.broadcast %72 : vector<4x8x1xf32> to vector<4x8x8xf32>
    %74 = arith.subf %70, %73 : vector<4x8x8xf32>
    %75 = math.exp %74 : vector<4x8x8xf32>
    %cst_23 = arith.constant dense<0.000000e+00> : vector<4x8xf32>
    %76 = vector.multi_reduction <add>, %75, %cst_23 [2] : vector<4x8x8xf32> to vector<4x8xf32>
    %77 = vector.shape_cast %76 : vector<4x8xf32> to vector<4x8x1xf32>
    %78 = tpu.reciprocal %77 {approx = true} : vector<4x8x1xf32> -> vector<4x8x1xf32>
    %79 = arith.truncf %75 : vector<4x8x8xf32> to vector<4x8x8xbf16>
    "tpu.trace_start"() <{level = 10 : i32, message = "bqk,bkd->bqd"}> : () -> ()
    %cst_24 = arith.constant dense<0.000000e+00> : vector<4x8x8xf32>
    %80 = tpu.matmul %79, %69, %cst_24 {dimension_numbers = #tpu.dot_dimension_numbers<[2], [1], [1], [2], [0, 0, 0, 1, 1, 2], [0], [0]>} : vector<4x8x8xbf16>, vector<4x8x8xbf16>, vector<4x8x8xf32> -> vector<4x8x8xf32>
    "tpu.trace_stop"() : () -> ()
    %81 = vector.broadcast %78 : vector<4x8x1xf32> to vector<4x8x8xf32>
    %82 = arith.mulf %80, %81 : vector<4x8x8xf32>
    %83 = vector.shape_cast %82 : vector<4x8x8xf32> to vector<32x8xf32>
    %84 = arith.truncf %83 : vector<32x8xf32> to vector<32x8xbf16>
    %85 = vector.extract_strided_slice %38 {offsets = [8, 0], sizes = [8, 32], strides = [1, 1]} : vector<32x32xbf16> to vector<8x32xbf16>
    %cst_25 = arith.constant dense<0.000000e+00> : vector<32x32xf32>
    %86 = tpu.matmul %84, %85, %cst_25 {dimension_numbers = #tpu.dot_dimension_numbers<[1], [0], [0], [1], [0, 0, 1, 1], [], []>} : vector<32x8xbf16>, vector<8x32xbf16>, vector<32x32xf32> -> vector<32x32xf32>
    %87 = arith.addf %63, %86 : vector<32x32xf32>
    %88 = vector.extract_strided_slice %37 {offsets = [0, 0, 16], sizes = [4, 8, 8], strides = [1, 1, 1]} : vector<4x8x96xf32> to vector<4x8x8xf32>
    %89 = arith.truncf %88 : vector<4x8x8xf32> to vector<4x8x8xbf16>
    %90 = vector.extract_strided_slice %37 {offsets = [0, 0, 48], sizes = [4, 8, 8], strides = [1, 1, 1]} : vector<4x8x96xf32> to vector<4x8x8xf32>
    %91 = arith.truncf %90 : vector<4x8x8xf32> to vector<4x8x8xbf16>
    %92 = vector.extract_strided_slice %37 {offsets = [0, 0, 80], sizes = [4, 8, 8], strides = [1, 1, 1]} : vector<4x8x96xf32> to vector<4x8x8xf32>
    %93 = arith.truncf %92 : vector<4x8x8xf32> to vector<4x8x8xbf16>
    "tpu.trace_start"() <{level = 10 : i32, message = "bqd,bkd->bqk"}> : () -> ()
    %cst_26 = arith.constant dense<0.000000e+00> : vector<4x8x8xf32>
    %94 = tpu.matmul %89, %91, %cst_26 {dimension_numbers = #tpu.dot_dimension_numbers<[2], [2], [1], [1], [0, 0, 0, 1, 1, 1], [0], [0]>} : vector<4x8x8xbf16>, vector<4x8x8xbf16>, vector<4x8x8xf32> -> vector<4x8x8xf32>
    "tpu.trace_stop"() : () -> ()
    %cst_27 = arith.constant dense<0xFF800000> : vector<4x8xf32>
    %95 = vector.multi_reduction <maximumf>, %94, %cst_27 [2] : vector<4x8x8xf32> to vector<4x8xf32>
    %96 = vector.shape_cast %95 : vector<4x8xf32> to vector<4x8x1xf32>
    %97 = vector.broadcast %96 : vector<4x8x1xf32> to vector<4x8x8xf32>
    %98 = arith.subf %94, %97 : vector<4x8x8xf32>
    %99 = math.exp %98 : vector<4x8x8xf32>
    %cst_28 = arith.constant dense<0.000000e+00> : vector<4x8xf32>
    %100 = vector.multi_reduction <add>, %99, %cst_28 [2] : vector<4x8x8xf32> to vector<4x8xf32>
    %101 = vector.shape_cast %100 : vector<4x8xf32> to vector<4x8x1xf32>
    %102 = tpu.reciprocal %101 {approx = true} : vector<4x8x1xf32> -> vector<4x8x1xf32>
    %103 = arith.truncf %99 : vector<4x8x8xf32> to vector<4x8x8xbf16>
    "tpu.trace_start"() <{level = 10 : i32, message = "bqk,bkd->bqd"}> : () -> ()
    %cst_29 = arith.constant dense<0.000000e+00> : vector<4x8x8xf32>
    %104 = tpu.matmul %103, %93, %cst_29 {dimension_numbers = #tpu.dot_dimension_numbers<[2], [1], [1], [2], [0, 0, 0, 1, 1, 2], [0], [0]>} : vector<4x8x8xbf16>, vector<4x8x8xbf16>, vector<4x8x8xf32> -> vector<4x8x8xf32>
    "tpu.trace_stop"() : () -> ()
    %105 = vector.broadcast %102 : vector<4x8x1xf32> to vector<4x8x8xf32>
    %106 = arith.mulf %104, %105 : vector<4x8x8xf32>
    %107 = vector.shape_cast %106 : vector<4x8x8xf32> to vector<32x8xf32>
    %108 = arith.truncf %107 : vector<32x8xf32> to vector<32x8xbf16>
    %109 = vector.extract_strided_slice %38 {offsets = [16, 0], sizes = [8, 32], strides = [1, 1]} : vector<32x32xbf16> to vector<8x32xbf16>
    %cst_30 = arith.constant dense<0.000000e+00> : vector<32x32xf32>
    %110 = tpu.matmul %108, %109, %cst_30 {dimension_numbers = #tpu.dot_dimension_numbers<[1], [0], [0], [1], [0, 0, 1, 1], [], []>} : vector<32x8xbf16>, vector<8x32xbf16>, vector<32x32xf32> -> vector<32x32xf32>
    %111 = arith.addf %87, %110 : vector<32x32xf32>
    %112 = vector.extract_strided_slice %37 {offsets = [0, 0, 24], sizes = [4, 8, 8], strides = [1, 1, 1]} : vector<4x8x96xf32> to vector<4x8x8xf32>
    %113 = arith.truncf %112 : vector<4x8x8xf32> to vector<4x8x8xbf16>
    %114 = vector.extract_strided_slice %37 {offsets = [0, 0, 56], sizes = [4, 8, 8], strides = [1, 1, 1]} : vector<4x8x96xf32> to vector<4x8x8xf32>
    %115 = arith.truncf %114 : vector<4x8x8xf32> to vector<4x8x8xbf16>
    %116 = vector.extract_strided_slice %37 {offsets = [0, 0, 88], sizes = [4, 8, 8], strides = [1, 1, 1]} : vector<4x8x96xf32> to vector<4x8x8xf32>
    %117 = arith.truncf %116 : vector<4x8x8xf32> to vector<4x8x8xbf16>
    "tpu.trace_start"() <{level = 10 : i32, message = "bqd,bkd->bqk"}> : () -> ()
    %cst_31 = arith.constant dense<0.000000e+00> : vector<4x8x8xf32>
    %118 = tpu.matmul %113, %115, %cst_31 {dimension_numbers = #tpu.dot_dimension_numbers<[2], [2], [1], [1], [0, 0, 0, 1, 1, 1], [0], [0]>} : vector<4x8x8xbf16>, vector<4x8x8xbf16>, vector<4x8x8xf32> -> vector<4x8x8xf32>
    "tpu.trace_stop"() : () -> ()
    %cst_32 = arith.constant dense<0xFF800000> : vector<4x8xf32>
    %119 = vector.multi_reduction <maximumf>, %118, %cst_32 [2] : vector<4x8x8xf32> to vector<4x8xf32>
    %120 = vector.shape_cast %119 : vector<4x8xf32> to vector<4x8x1xf32>
    %121 = vector.broadcast %120 : vector<4x8x1xf32> to vector<4x8x8xf32>
    %122 = arith.subf %118, %121 : vector<4x8x8xf32>
    %123 = math.exp %122 : vector<4x8x8xf32>
    %cst_33 = arith.constant dense<0.000000e+00> : vector<4x8xf32>
    %124 = vector.multi_reduction <add>, %123, %cst_33 [2] : vector<4x8x8xf32> to vector<4x8xf32>
    %125 = vector.shape_cast %124 : vector<4x8xf32> to vector<4x8x1xf32>
    %126 = tpu.reciprocal %125 {approx = true} : vector<4x8x1xf32> -> vector<4x8x1xf32>
    %127 = arith.truncf %123 : vector<4x8x8xf32> to vector<4x8x8xbf16>
    "tpu.trace_start"() <{level = 10 : i32, message = "bqk,bkd->bqd"}> : () -> ()
    %cst_34 = arith.constant dense<0.000000e+00> : vector<4x8x8xf32>
    %128 = tpu.matmul %127, %117, %cst_34 {dimension_numbers = #tpu.dot_dimension_numbers<[2], [1], [1], [2], [0, 0, 0, 1, 1, 2], [0], [0]>} : vector<4x8x8xbf16>, vector<4x8x8xbf16>, vector<4x8x8xf32> -> vector<4x8x8xf32>
    "tpu.trace_stop"() : () -> ()
    %129 = vector.broadcast %126 : vector<4x8x1xf32> to vector<4x8x8xf32>
    %130 = arith.mulf %128, %129 : vector<4x8x8xf32>
    %131 = vector.shape_cast %130 : vector<4x8x8xf32> to vector<32x8xf32>
    %132 = arith.truncf %131 : vector<32x8xf32> to vector<32x8xbf16>
    %133 = vector.extract_strided_slice %38 {offsets = [24, 0], sizes = [8, 32], strides = [1, 1]} : vector<32x32xbf16> to vector<8x32xbf16>
    %cst_35 = arith.constant dense<0.000000e+00> : vector<32x32xf32>
    %134 = tpu.matmul %132, %133, %cst_35 {dimension_numbers = #tpu.dot_dimension_numbers<[1], [0], [0], [1], [0, 0, 1, 1], [], []>} : vector<32x8xbf16>, vector<8x32xbf16>, vector<32x32xf32> -> vector<32x32xf32>
    %135 = arith.addf %111, %134 : vector<32x32xf32>
    %136 = arith.addf %10, %135 : vector<32x32xf32>
    %137 = vector.broadcast %3 : vector<1x32xf32> to vector<32x32xf32>
    %138 = arith.addf %136, %137 : vector<32x32xf32>
    %cst_36 = arith.constant dense<0.000000e+00> : vector<32xf32>
    %139 = vector.multi_reduction <add>, %138, %cst_36 [1] : vector<32x32xf32> to vector<32xf32>
    %140 = vector.shape_cast %139 : vector<32xf32> to vector<32x1xf32>
    %cst_37 = arith.constant 3.200000e+01 : f32
    %141 = vector.broadcast %cst_37 : f32 to vector<32x1xf32>
    %142 = arith.divf %140, %141 : vector<32x1xf32>
    %143 = vector.broadcast %142 : vector<32x1xf32> to vector<32x32xf32>
    %144 = arith.subf %138, %143 : vector<32x32xf32>
    %145 = arith.mulf %144, %144 : vector<32x32xf32>
    %cst_38 = arith.constant dense<0.000000e+00> : vector<32xf32>
    %146 = vector.multi_reduction <add>, %145, %cst_38 [1] : vector<32x32xf32> to vector<32xf32>
    %147 = vector.shape_cast %146 : vector<32xf32> to vector<32x1xf32>
    %cst_39 = arith.constant 3.200000e+01 : f32
    %148 = vector.broadcast %cst_39 : f32 to vector<32x1xf32>
    %149 = arith.divf %147, %148 : vector<32x1xf32>
    %cst_40 = arith.constant 9.99999997E-7 : f32
    %150 = vector.broadcast %cst_40 : f32 to vector<32x1xf32>
    %151 = arith.addf %149, %150 : vector<32x1xf32>
    %152 = math.rsqrt %151 : vector<32x1xf32>
    %153 = vector.broadcast %152 : vector<32x1xf32> to vector<32x32xf32>
    %154 = arith.mulf %144, %153 : vector<32x32xf32>
    %155 = vector.broadcast %4 : vector<1x32xf32> to vector<32x32xf32>
    %156 = arith.mulf %154, %155 : vector<32x32xf32>
    %157 = vector.broadcast %5 : vector<1x32xf32> to vector<32x32xf32>
    %158 = arith.addf %156, %157 : vector<32x32xf32>
    %159 = arith.truncf %158 : vector<32x32xf32> to vector<32x32xbf16>
    %c0_41 = arith.constant 0 : index
    %c0_42 = arith.constant 0 : index
    %160 = vector.load %arg6[%c0_41, %c0_42] : memref<32x64xbf16, #tpu.memory_space<vmem>>, vector<32x64xbf16>
    %cst_43 = arith.constant dense<0.000000e+00> : vector<32x64xf32>
    %161 = tpu.matmul %159, %160, %cst_43 {dimension_numbers = #tpu.dot_dimension_numbers<[1], [0], [0], [1], [0, 0, 1, 1], [], []>} : vector<32x32xbf16>, vector<32x64xbf16>, vector<32x64xf32> -> vector<32x64xf32>
    %c0_44 = arith.constant 0 : index
    %c0_45 = arith.constant 0 : index
    %162 = vector.load %arg7[%c0_44, %c0_45] : memref<1x64xf32, #tpu.memory_space<vmem>>, vector<1x64xf32>
    %163 = vector.broadcast %162 : vector<1x64xf32> to vector<32x64xf32>
    %164 = arith.addf %161, %163 : vector<32x64xf32>
    %cst_46 = arith.constant 5.000000e-01 : f32
    %165 = vector.broadcast %cst_46 : f32 to vector<32x64xf32>
    %166 = arith.mulf %165, %164 : vector<32x64xf32>
    %cst_47 = arith.constant 0.707106769 : f32
    %167 = vector.broadcast %cst_47 : f32 to vector<32x64xf32>
    %168 = arith.mulf %164, %167 : vector<32x64xf32>
    %169 = math.erf %168 : vector<32x64xf32>
    %cst_48 = arith.constant 1.000000e+00 : f32
    %170 = vector.broadcast %cst_48 : f32 to vector<32x64xf32>
    %171 = arith.addf %170, %169 : vector<32x64xf32>
    %172 = arith.mulf %166, %171 : vector<32x64xf32>
    %173 = arith.truncf %172 : vector<32x64xf32> to vector<32x64xbf16>
    %c0_49 = arith.constant 0 : index
    %c0_50 = arith.constant 0 : index
    %174 = vector.load %arg8[%c0_49, %c0_50] : memref<64x32xbf16, #tpu.memory_space<vmem>>, vector<64x32xbf16>
    %cst_51 = arith.constant dense<0.000000e+00> : vector<32x32xf32>
    %175 = tpu.matmul %173, %174, %cst_51 {dimension_numbers = #tpu.dot_dimension_numbers<[1], [0], [0], [1], [0, 0, 1, 1], [], []>} : vector<32x64xbf16>, vector<64x32xbf16>, vector<32x32xf32> -> vector<32x32xf32>
    %176 = arith.addf %138, %175 : vector<32x32xf32>
    %177 = vector.broadcast %6 : vector<1x32xf32> to vector<32x32xf32>
    %178 = arith.addf %176, %177 : vector<32x32xf32>
    %cst_52 = arith.constant dense<0.000000e+00> : vector<32xf32>
    %179 = vector.multi_reduction <add>, %178, %cst_52 [1] : vector<32x32xf32> to vector<32xf32>
    %180 = vector.shape_cast %179 : vector<32xf32> to vector<32x1xf32>
    %cst_53 = arith.constant 3.200000e+01 : f32
    %181 = vector.broadcast %cst_53 : f32 to vector<32x1xf32>
    %182 = arith.divf %180, %181 : vector<32x1xf32>
    %183 = vector.broadcast %182 : vector<32x1xf32> to vector<32x32xf32>
    %184 = arith.subf %178, %183 : vector<32x32xf32>
    %185 = arith.mulf %184, %184 : vector<32x32xf32>
    %cst_54 = arith.constant dense<0.000000e+00> : vector<32xf32>
    %186 = vector.multi_reduction <add>, %185, %cst_54 [1] : vector<32x32xf32> to vector<32xf32>
    %187 = vector.shape_cast %186 : vector<32xf32> to vector<32x1xf32>
    %cst_55 = arith.constant 3.200000e+01 : f32
    %188 = vector.broadcast %cst_55 : f32 to vector<32x1xf32>
    %189 = arith.divf %187, %188 : vector<32x1xf32>
    %cst_56 = arith.constant 9.99999997E-7 : f32
    %190 = vector.broadcast %cst_56 : f32 to vector<32x1xf32>
    %191 = arith.addf %189, %190 : vector<32x1xf32>
    %192 = math.rsqrt %191 : vector<32x1xf32>
    %193 = vector.broadcast %192 : vector<32x1xf32> to vector<32x32xf32>
    %194 = arith.mulf %184, %193 : vector<32x32xf32>
    %195 = vector.broadcast %7 : vector<1x32xf32> to vector<32x32xf32>
    %196 = arith.mulf %194, %195 : vector<32x32xf32>
    %197 = vector.broadcast %8 : vector<1x32xf32> to vector<32x32xf32>
    %198 = arith.addf %196, %197 : vector<32x32xf32>
    %199 = vector.shape_cast %198 : vector<32x32xf32> to vector<4x8x32xf32>
    %c0_57 = arith.constant 0 : index
    %c0_58 = arith.constant 0 : index
    %c0_59 = arith.constant 0 : index
    %200 = vector.load %arg9[%c0_57, %c0_58, %c0_59] : memref<4x8x32xf32, #tpu.memory_space<vmem>>, vector<4x8x32xf32>
    tpu.vector_store %arg9[%c0_57, %c0_58, %c0_59], %199 {strides = array<i32>} : memref<4x8x32xf32, #tpu.memory_space<vmem>>, vector<4x8x32xf32>,
    return
  }
  func.func @transform_0(%arg0: i32) -> (i32, i32, i32) {
    %c0_i32 = arith.constant 0 : i32
    %c0_i32_0 = arith.constant 0 : i32
    %c0_i32_1 = arith.constant 0 : i32
    return %arg0, %c0_i32, %c0_i32_0 : i32, i32, i32
  }
  func.func @transform_1(%arg0: i32) -> (i32, i32) {
    %c0_i32 = arith.constant 0 : i32
    %c0_i32_0 = arith.constant 0 : i32
    %c0_i32_1 = arith.constant 0 : i32
    return %c0_i32, %c0_i32_0 : i32, i32
  }
  func.func @transform_2(%arg0: i32) -> (i32, i32) {
    %c0_i32 = arith.constant 0 : i32
    %c0_i32_0 = arith.constant 0 : i32
    %c0_i32_1 = arith.constant 0 : i32
    return %c0_i32, %c0_i32_0 : i32, i32
  }
  func.func @transform_3(%arg0: i32) -> (i32, i32) {
    %c0_i32 = arith.constant 0 : i32
    %c0_i32_0 = arith.constant 0 : i32
    %c0_i32_1 = arith.constant 0 : i32
    return %c0_i32, %c0_i32_0 : i32, i32
  }
  func.func @transform_4(%arg0: i32) -> (i32, i32) {
    %c0_i32 = arith.constant 0 : i32
    %c0_i32_0 = arith.constant 0 : i32
    %c0_i32_1 = arith.constant 0 : i32
    return %c0_i32, %c0_i32_0 : i32, i32
  }
  func.func @transform_5(%arg0: i32) -> (i32, i32) {
    %c0_i32 = arith.constant 0 : i32
    %c0_i32_0 = arith.constant 0 : i32
    %c0_i32_1 = arith.constant 0 : i32
    return %c0_i32, %c0_i32_0 : i32, i32
  }
  func.func @transform_6(%arg0: i32) -> (i32, i32) {
    %c0_i32 = arith.constant 0 : i32
    %c0_i32_0 = arith.constant 0 : i32
    %c0_i32_1 = arith.constant 0 : i32
    return %c0_i32, %c0_i32_0 : i32, i32
  }
  func.func @transform_7(%arg0: i32) -> (i32, i32) {
    %c0_i32 = arith.constant 0 : i32
    %c0_i32_0 = arith.constant 0 : i32
    %c0_i32_1 = arith.constant 0 : i32
    return %c0_i32, %c0_i32_0 : i32, i32
  }
  func.func @transform_8(%arg0: i32) -> (i32, i32, i32) {
    %c0_i32 = arith.constant 0 : i32
    %c0_i32_0 = arith.constant 0 : i32
    %c0_i32_1 = arith.constant 0 : i32
    return %arg0, %c0_i32, %c0_i32_0 : i32, i32, i32
  }
}

</mosaic_0001>

<bundles_post_ra>
// kernel: ste_pallas.1
= control target key start
LH: loop header
LB: loop body
LE: loop exit
PB: predicated region body
PF: predicated region fallthrough
CT: control target
= control target key end

     0   :  { %s3390_s0 = inlined_call_operand.hbm [shape: f32[8,8,32], index: 0, kind: input, shape index: {}]   ;;  %s3391_s1 = inlined_call_operand.hbm [shape: f32[8,32], index: 1, kind: input, shape index: {}]   ;;  %s3392_s2 = inlined_call_operand.vmem [shape: bf16[32,96], index: 2, kind: input, shape index: {}]   ;;  %s3393_s3 = inlined_call_operand.vmem [shape: f32[1,96], index: 3, kind: input, shape index: {}]   ;;  %s3394_s4 = inlined_call_operand.vmem [shape: bf16[32,32], index: 4, kind: input, shape index: {}]   ;;  %s3395_s5 = inlined_call_operand.vmem [shape: bf16[32,64], index: 5, kind: input, shape index: {}]   ;;  %s3396_s6 = inlined_call_operand.hbm [shape: f32[1,64], index: 6, kind: input, shape index: {}]   ;;  %s3397_s7 = inlined_call_operand.vmem [shape: bf16[64,32], index: 7, kind: input, shape index: {}]   ;;  %s3398_s8 = inlined_call_operand.hbm [shape: f32[8,8,32], index: 8, kind: output, shape index: {}]  }
   0x1   :  { %3402 = sst [smem:[#allocation15_spill]] %s3391_s1 }
   0x2   :  { %3403 = sst [smem:[#allocation16_spill]] %s3396_s6 }
   0x3   :  { %13 = vsyncpa [#allocation3], 0 }
   0x4   :  { %15 = vsyncpa [#allocation3 + $0x1], 0 }
   0x5   :  { %16 = vsyncpa [#allocation6], 0 }
   0x6   :  { %17 = vsyncpa [#allocation4], 0 }
   0x7   :  { %19 = vsyncpa [#allocation4 + $0x1], 0  ;;  %s2688_s27 = smov 0   ;;  %s2690_s28 = smov 0  }
   0x8   :  { %s2692_s29 = smov 0   ;;  %s2694_s30 = smov 0  }
   0x9 LB: > { %s2709_s9 = sadd.s32 4294967295, %s2623_s30   ;;  %s2163_s10 = sadd.s32 4294967294, %s2623_s30   ;;  %s2623_s30 = sphi %s2694_s30, %s3419_s30   ;;  %s2619_s29 = sphi %s2692_s29, %s3423_s29   ;;  %s2615_s28 = sphi %s2690_s28, %s3422_s28   ;;  %s2611_s27 = sphi %s2688_s27, %s3421_s27  }
   0xa   : > { %s2713_s11 = sadd.s32 1, %s2623_s30   ;;  %s32_s12 = sadd.s32 1, %s2619_s29 }
   0xb   : > { %3404 = sst [smem:[#allocation12_spill]] %s2713_s11  ;;  %s29_s13 = ssub.s32 %s2623_s30, %s2713_s11 }
   0xc   : > { %p39_p0 = scmp.ne.s32.totalorder %s2619_s29, %s2615_s28  ;;  %p30_p1 = scmp.eq.s32.totalorder %s29_s13, 0 }
   0xd   : > { %p40_p2 = scmp.eq.s32.totalorder %s2623_s30, 0  ;;  %p45_p3 = scmp.ne.s32.totalorder %s2615_s28, %s2611_s27 }
   0xe   : > { %p46_p4 = scmp.eq.s32.totalorder %s2709_s9, 0  ;;  %p216_p7 = scmp.eq.s32.totalorder %s2709_s9, 1 }
   0xf   : > { %s2725_s14 = scalar_select %p30_p1, %s2619_s29, %s32_s12  }
  0x10   : > { %p2727_p5 = por %p40_p2, %p39_p0  ;;  %p2733_p6 = por %p46_p4, %p45_p3 }
  0x11   : > { %3405 = sst [smem:[#allocation13_spill]] %s2725_s14  ;;  %p222_p8 = scmp.eq.s32.totalorder %s2163_s10, 1 }
  0x12   : > { %p2164_p9 = scmp.ge.s32.totalorder %s2623_s30, 1  ;;  %p229_p10 = scmp.lt.s32.totalorder %s2623_s30, 3 }
  0x13   : > { %p2740_p11 = por %p216_p7, %p39_p0  ;;  %p2744_p12 = por %p222_p8, %p45_p3 }
  0x14   : > { %p2748_p13 = pnand %p2164_p9, %p229_p10  ;;  %s3412_s1 = sld [smem:[#allocation15_spill]] }
  0x15   : > { %s3409_s18 = scalar_select %p2744_p12, 1, 0 }
  0x16   : > { %p2287_p1 = pneg %p2748_p13  ;;  %s2625_s23 = smov [#allocation5]  }
  0x17   : > { %3410 = sst [smem:[#allocation14_spill]] %s3409_s18  ;;  %s243_s24 = sshll.u32 %s2625_s23, 4  ;;  %s244_s24 = int_to_ptr.vmem [resolvable:$true] %s243_s24 }
  0x18   : > { %p2288_p2 = pnand %p2287_p1, %p46_p4  ;;  %p2304_p3 = scmp.lt.s32.totalorder %s2623_s30, 2 }
  0x19   : > { %s3413_s6 = sld [smem:[#allocation16_spill]]  ;;  %s2626_s13 = smov [#allocation7]  }
  0x1a   : > { %s241_s22 = sshll.u32 %s3412_s1, 4  ;;  %p2766_p7 = pnand %p2304_p3, %p2727_p5  ;;  %s242_s22 = int_to_ptr.hbm [resolvable:$true] %s241_s22 }
  0x1b   : > { %2290 = dma.hbm_to_vmem [thread:$0]  (!%p2288_p2), %s242_s22, 128, %s244_s24, [#allocation6]  }
  0x1c   : > { %s267_s20 = sshll.u32 %s2626_s13, 4  ;;  %s281_s21 = sand.u32 1, %s2619_s29   ;;  %s268_s20 = int_to_ptr.vmem [resolvable:$true] %s267_s20 }
  0x1d   : > { %s2168_s23 = sshll.u32 %s281_s21, 5  ;;  %s2263_s1 = sshll.u32 %s2623_s30, 5 }
  0x1e   : > { %s290_s25 = scalar_lea.hbm %s3390_s0, %s2263_s1  ;;  %s285_s26 = scalar_lea.vmem [#allocation2], %s2168_s23 }
  0x1f   : > { %s265_s10 = sshll.u32 %s3413_s6, 4  ;;  %s293_s6 = sshll.u32 %s285_s26, 4  ;;  %s266_s10 = int_to_ptr.hbm [resolvable:$true] %s265_s10  ;;  %s294_s6 = int_to_ptr.vmem [resolvable:$true] %s293_s6 }
  0x20   : > { %2293 = dma.hbm_to_vmem [thread:$0]  (!%p2288_p2), %s266_s10, 16, %s268_s20, [#allocation6]  }
  0x21   : > { %s291_s22 = sshll.u32 %s290_s25, 4  ;;  %s282_s15 = scalar_lea.sflag [#allocation3], %s281_s21  ;;  %s292_s22 = int_to_ptr.hbm [resolvable:$true] %s291_s22 }
  0x22   : > { %s2523_s24 = sshra.s32 %s292_s22, 4  ;;  %p2527_p8 = pneg %p2766_p7  ;;  %s2524_s24 = int_to_ptr.hbm [resolvable:$true] %s2523_s24 }
  0x23   : > { %s2525_s18 = scalar_lea.hbm %s2524_s24, 32  ;;  %s2530_s20 = scalar_lea.hbm %s3390_s0, 64 }
  0x24   : > { %p2526_p5 = scmp.ne.s32.totalorder %s2524_s24, %s2525_s18  ;;  %p2531_p1 = scmp.lt.s32.totalorder %s2524_s24, %s3390_s0 }
  0x25   : > { %p2532_p2 = scmp.lt.s32.totalorder %s2530_s20, %s2525_s18 }
  0x26   : > { %p2528_p9 = pnand %p2527_p8, %p2526_p5 }
  0x27   : > { %p2533_p3 = por %p2532_p2, %p2531_p1 }
  0x28   : > { %p2529_p10 = pneg %p2528_p9 }
  0x2a   : > { %p2534_p0 = pnand %p2533_p3, %p2529_p10 }
  0x2c   : > { %2537 = shalt.err (!%p2534_p0)
}
  0x2d   : > { %s2627_s14 = smov 128   ;;  %s2628_s21 = smov 8  }
  0x2e   : > { %2297 = dma.hbm_to_vmem [thread:$0]  (!%p2766_p7), %s292_s22, 512, %s294_s6, %s282_s15, %s2627_s14, %s2627_s14, %s2628_s21  }
  0x2f   : > { %305 = sbr.rel (%p2748_p13) target bundleno = 2870 (0xb36), region = 52  ;;  %s2788_s23 = sand.u32 (!%p2748_p13), 1, %s2615_s28  }
  0x30   : > { %s2172_s25 = sshll.u32 (!%p2748_p13), %s2788_s23, 5  ;;  %s308_s18 = scalar_lea.sflag (!%p2748_p13), [#allocation3], %s2788_s23 }
  0x31   : > { %s2794_s26 = scalar_lea.vmem (!%p2748_p13), [#allocation2], %s2172_s25 }
  0x34   : > { %2598 = dma.done.wait (%p2733_p6), %s308_s18, 512  }
  0x35   : > { %2600 = vsyncadd (%p2733_p6), %s308_s18, 4294966784 }
  0x36   : > { %2602 = dma.done.wait (%p46_p4), [#allocation6], 144  }
  0x37   : > { %2604 = vsyncadd (%p46_p4), [#allocation6], 4294967152  ;;  %vm363_vm0 = vcmask 261120   ;;  %v361_v0 = vld [vmem:[%s2794_s26 + $0x10] sm:$0xff]  ;;  %v359_v1 = vld [vmem:[%s2794_s26] sm:$0xff]  ;;  %v2629_v8 = vmov 32.0  }
  0x38   : > { %v370_v2 = vsel %vm363_vm0, %v361_v0, 0.0  ;;  %v364_v3 = vsel %vm363_vm0, %v359_v1, 0.0  ;;  %v362_v4 = vld [vmem:[%s2794_s26 + $0x18] sm:$0xff]  ;;  %v360_v5 = vld [vmem:[%s2794_s26 + $0x8] sm:$0xff]  ;;  %2360 = vrcp.f32 %v2629_v8  ;;  %v2264_v40 = vld [vmem:[%s3392_s2] sm:$0xff]  ;;  %s2630_s24 = smov 96  }
  0x39   : > { %371 = vadd.xlane.f32.xlu1 %v370_v2  ;;  %365 = vadd.xlane.f32.xlu0 %v364_v3  ;;  %v373_v6 = vsel %vm363_vm0, %v362_v4, 0.0  ;;  %v367_v7 = vsel %vm363_vm0, %v360_v5, 0.0  ;;  %v2265_v35 = vld [vmem:[%s3392_s2 + $0x8] sm:$0xff]  ;;  %s2631_s10 = smov 64   ;;  %s2632_s13 = smov 88   ;;  %vm529_vm14 = vcmask 64512  }
  0x3a   : > { %503 = vmatpush.bf16.msra.mxu0 %v2265_v35  ;;  %2273 = vmatpush.bf16.msra.mxu3 %v2265_v35  ;;  %s2633_s20 = smov 120   ;;  %vm670_vm15 = vcmask 1043456   ;;  %s2634_s11 = smov 56  }
  0x3b   : > { %s2635_s1 = smov 80   ;;  %s2636_s14 = smov 112  }
  0x3c   : > { %s2637_s21 = smov 48   ;;  %s2638_s18 = smov 104  }
  0x3d   : > { %s2639_s6 = smov 72   ;;  %s2640_s15 = smov 40  }
  0x3e   : > { %v2361_v9 = vpop.eup %2360  ;;  %504 = vmatpush.bf16.msra.mxu0 %v2264_v40  ;;  %2274 = vmatpush.bf16.msra.mxu3 %v2264_v40 }
  0x3f   : > { %v377_v10 = vmul.f32 32.0, %v2361_v9  ;;  %vm381_vm1 = vweird.f32 %v2361_v9 }
  0x41   : > { %374 = vadd.xlane.f32.xlu1 %v373_v6  ;;  %368 = vadd.xlane.f32.xlu0 %v367_v7  ;;  %v378_v11 = vsub.f32 1.0, %v377_v10  ;;  %v358_v6 = vld [vmem:[#allocation5] sm:$0xff] }
  0x43   : > { %v379_v12 = vmul.f32 %v2361_v9, %v378_v11 }
  0x45   : > { %v380_v13 = vadd.f32 %v2361_v9, %v379_v12  ;;  %v459_v12 = vperm.slane %v358_v6, 0 }
  0x47   : > { %v2812_v14 = vsel %vm381_vm1, %v2361_v9, %v380_v13 }
  0xac   : > { %v372_v15 = vpop.xlane.xlu1 %371  ;;  %v366_v16 = vpop.xlane.xlu0 %365 }
  0xad   : > { %v385_v17 = vmul.f32 %v2812_v14, %v372_v15  ;;  %v383_v18 = vmul.f32 %v2812_v14, %v366_v16 }
  0xaf   : > { %v2816_v19 = vsub.f32 %v361_v0, %v385_v17  ;;  %v2818_v20 = vsub.f32 %v359_v1, %v383_v18 }
  0xb1   : > { %v393_v21 = vmul.f32 %v2816_v19, %v2816_v19  ;;  %v391_v22 = vmul.f32 %v2818_v20, %v2818_v20 }
  0xb3   : > { %v401_v23 = vsel %vm363_vm0, %v393_v21, 0.0  ;;  %v395_v24 = vsel %vm363_vm0, %v391_v22, 0.0  ;;  %v464_v22 = vperm.slane %v358_v6, 1 }
  0xb4   : > { %v375_v25 = vpop.xlane.xlu1 %374  ;;  %402 = vadd.xlane.f32.xlu0 %v401_v23  ;;  %396 = vadd.xlane.f32.xlu2 %v395_v24  ;;  %v369_v26 = vpop.xlane.xlu0 %368 }
  0xb5   : > { %v386_v27 = vmul.f32 %v2812_v14, %v375_v25  ;;  %v384_v28 = vmul.f32 %v2812_v14, %v369_v26 }
  0xb7   : > { %v2828_v29 = vsub.f32 %v362_v4, %v386_v27  ;;  %v2830_v30 = vsub.f32 %v360_v5, %v384_v28 }
  0xb9   : > { %v394_v31 = vmul.f32 %v2828_v29, %v2828_v29  ;;  %v392_v32 = vmul.f32 %v2830_v30, %v2830_v30 }
  0xbb   : > { %v404_v33 = vsel %vm363_vm0, %v394_v31, 0.0  ;;  %v398_v34 = vsel %vm363_vm0, %v392_v32, 0.0 }
  0xbc   : > { %405 = vadd.xlane.f32.xlu1 %v404_v33  ;;  %399 = vadd.xlane.f32.xlu2 %v398_v34 }
 0x127   : > { %v397_v36 = vpop.xlane.xlu2 %396  ;;  %v403_v37 = vpop.xlane.xlu0 %402 }
 0x128   : > { %v407_v38 = vmul.f32 %v397_v36, %v2812_v14  ;;  %v409_v39 = vmul.f32 %v403_v37, %v2812_v14 }
 0x12a   : > { %v411_v41 = vadd.f32 1e-06, %v407_v38  ;;  %v413_v42 = vadd.f32 1e-06, %v409_v39 }
 0x12c   : > { %2362 = vrsqrt.f32 %v411_v41  ;;  %vm421_vm2 = vweird.f32 %v411_v41  ;;  %vm441_vm6 = vweird.f32 %v413_v42 }
 0x12d   : > { %2364 = vrsqrt.f32 %v413_v42 }
 0x12f   : > { %v406_v43 = vpop.xlane.xlu1 %405  ;;  %v400_v44 = vpop.xlane.xlu2 %399 }
 0x130   : > { %v410_v45 = vmul.f32 %v406_v43, %v2812_v14  ;;  %v408_v46 = vmul.f32 %v400_v44, %v2812_v14 }
 0x132   : > { %v2363_v47 = vpop.eup %2362  ;;  %v414_v48 = vadd.f32 1e-06, %v410_v45  ;;  %v412_v49 = vadd.f32 1e-06, %v408_v46 }
 0x133   : > { %v2365_v50 = vpop.eup %2364  ;;  %v416_v51 = vmul.f32 %v2363_v47, %v411_v41  ;;  %vm422_vm3 = vweird.f32 %v2363_v47 }
 0x134   : > { %v436_v52 = vmul.f32 %v2365_v50, %v413_v42  ;;  %2366 = vrsqrt.f32 %v414_v48  ;;  %vm442_vm4 = vweird.f32 %v2365_v50  ;;  %vm2848_vm5 = vmor %vm421_vm2, %vm422_vm3  ;;  %vm431_vm8 = vweird.f32 %v412_v49 }
 0x135   : > { %v417_v53 = vmul.f32 %v2363_v47, %v416_v51  ;;  %2368 = vrsqrt.f32 %v412_v49  ;;  %vm443_vm7 = vmor %vm441_vm6, %vm442_vm4  ;;  %vm451_vm11 = vweird.f32 %v414_v48 }
 0x136   : > { %v437_v54 = vmul.f32 %v2365_v50, %v436_v52 }
 0x137   : > { %v418_v55 = vmul.f32 0.5, %v417_v53 }
 0x138   : > { %v438_v56 = vmul.f32 0.5, %v437_v54 }
 0x139   : > { %v419_v57 = vsub.f32 1.5, %v418_v55 }
 0x13a   : > { %v2367_v58 = vpop.eup %2366  ;;  %v439_v59 = vsub.f32 1.5, %v438_v56 }
 0x13b   : > { %v2369_v60 = vpop.eup %2368  ;;  %v446_v61 = vmul.f32 %v2367_v58, %v414_v48  ;;  %v420_v62 = vmul.f32 %v2363_v47, %v419_v57  ;;  %vm452_vm10 = vweird.f32 %v2367_v58 }
 0x13c   : > { %v440_v63 = vmul.f32 %v2365_v50, %v439_v59  ;;  %v426_v0 = vmul.f32 %v2369_v60, %v412_v49  ;;  %vm432_vm9 = vweird.f32 %v2369_v60  ;;  %vm453_vm13 = vmor %vm451_vm11, %vm452_vm10 }
 0x13d   : > { %v447_v2 = vmul.f32 %v2367_v58, %v446_v61  ;;  %v424_v7 = vsel %vm2848_vm5, %v2363_v47, %v420_v62  ;;  %vm433_vm12 = vmor %vm431_vm8, %vm432_vm9 }
 0x13e   : > { %v427_v3 = vmul.f32 %v2369_v60, %v426_v0  ;;  %v444_v4 = vsel %vm443_vm7, %v2365_v50, %v440_v63  ;;  %v455_v13 = vmul.f32 %v424_v7, %v2818_v20 }
 0x13f   : > { %v448_v5 = vmul.f32 0.5, %v447_v2  ;;  %v457_v10 = vmul.f32 %v444_v4, %v2816_v19 }
 0x140   : > { %v428_v8 = vmul.f32 0.5, %v427_v3  ;;  %v460_v25 = vmul.f32 %v459_v12, %v455_v13 }
 0x141   : > { %v449_v9 = vsub.f32 1.5, %v448_v5  ;;  %v462_v23 = vmul.f32 %v459_v12, %v457_v10 }
 0x142   : > { %v429_v11 = vsub.f32 1.5, %v428_v8  ;;  %v465_v31 = vadd.f32 %v464_v22, %v460_v25 }
 0x143   : > { %v450_v15 = vmul.f32 %v2367_v58, %v449_v9  ;;  %v467_v27 = vadd.f32 %v464_v22, %v462_v23 }
 0x144   : > { %v430_v16 = vmul.f32 %v2369_v60, %v429_v11 }
 0x145   : > { %v454_v17 = vsel %vm453_vm13, %v2367_v58, %v450_v15 }
 0x146   : > { %v458_v18 = vmul.f32 %v454_v17, %v2828_v29  ;;  %v434_v21 = vsel %vm433_vm12, %v2369_v60, %v430_v16  ;;  %v2358_v29 = vld [vmem:[%s3393_s3] ss:$0 sm:$0xff] }
 0x147   : > { %v456_v24 = vmul.f32 %v434_v21, %v2830_v30 }
 0x148   : > { %v463_v26 = vmul.f32 %v459_v12, %v458_v18 }
 0x149   : > { %v461_v19 = vmul.f32 %v459_v12, %v456_v24 }
 0x14a   : > { %v468_v28 = vadd.f32 %v464_v22, %v463_v26 }
 0x14b   : > { %v466_v20 = vadd.f32 %v464_v22, %v461_v19 }
 0x14c   : > { %v470_v32 = vpack.c.bf16 %v468_v28, %v467_v27 }
 0x14d   : > { %v469_v33 = vpack.c.bf16 %v466_v20, %v465_v31 }
 0x14e   : > { %2185 = vmatmul.msk.bf16.vlgmr.msra.gmra.mxu3 %vm363_vm0, %v470_v32 }
 0x14f   : > { %2184 = vmatmul.msk.bf16.vlgmr.msra.gmra.mxu0 %vm363_vm0, %v469_v33 }
 0x1cc   : > { %v506_v34 = vpop.f32.mrf.mxu0 }
 0x1cd   : > { %v507_v35 = vadd.f32 %v2358_v29, %v506_v34 }
 0x1cf   : > { %v520_v30 = vpack.c.bf16 %v507_v35, %v507_v35 }
 0x1d1   : > { %v525_v36 = vunpack.c.l.b16 %v520_v30  ;;  %v511_v37 = vpop.f32.mrf.mxu3 }
 0x1d2   : > { %v512_v38 = vadd.f32 %v2358_v29, %v511_v37 }
 0x1d3   : > { %v2863_v39 = vpack.c.b16 %v525_v36, %v525_v36 }
 0x1d4   : > { %v522_v40 = vpack.c.bf16 %v512_v38, %v512_v38  ;;  %v508_v41 = vpop.f32.mrf.mxu0 }
 0x1d5   : > { %v509_v42 = vadd.f32 %v2358_v29, %v508_v41  ;;  %527 = vrot.lane.b32.xlu2 %v2863_v39, %s2630_s24 }
 0x1d6   : > { %v574_v43 = vunpack.c.l.b16 %v522_v40 }
 0x1d7   : > { %v521_v44 = vpack.c.bf16 %v509_v42, %v509_v42 }
 0x1d8   : > { %v2866_v45 = vpack.c.b16 %v574_v43, %v574_v43 }
 0x1d9   : > { %v550_v46 = vunpack.c.l.b16 %v521_v44  ;;  %v513_v47 = vpop.f32.mrf.mxu3 }
 0x1da   : > { %v514_v48 = vadd.f32 %v2358_v29, %v513_v47  ;;  %576 = vrot.lane.b32.xlu0 %v2866_v45, %s2630_s24 }
 0x1db   : > { %v2869_v49 = vpack.c.b16 %v550_v46, %v550_v46 }
 0x1dc   : > { %v523_v50 = vpack.c.bf16 %v514_v48, %v514_v48 }
 0x1dd   : > { %552 = vrot.lane.b32.xlu2 %v2869_v49, %s2630_s24 }
 0x1de   : > { %v598_v51 = vunpack.c.l.b16 %v523_v50 }
 0x1e0   : > { %v2872_v52 = vpack.c.b16 %v598_v51, %v598_v51 }
 0x1e2   : > { %600 = vrot.lane.b32.xlu1 %v2872_v52, %s2630_s24  ;;  %s3343_s24 = scalar_lea.vmem [#allocation8], %s2172_s25  ;;  %s2272_s25 = sshll.u32 %s2709_s9, 5 }
 0x1ea   : > { %708 = vrot.lane.b32.xlu1 %v2866_v45, %s2631_s10 }
 0x1f2   : > { %729 = vrot.lane.b32.xlu1 %v2872_v52, %s2631_s10 }
 0x1fa   : > { %804 = vrot.lane.b32.xlu1 %v2866_v45, %s2632_s13 }
 0x202   : > { %827 = vrot.lane.b32.xlu1 %v2872_v52, %s2632_s13 }
 0x20a   : > { %802 = vrot.lane.b32.xlu1 %v2866_v45, %s2633_s20 }
 0x22f   : > { %v528_v53 = vpop.permute.xlu2 %527 }
 0x230   : > { %v534_v54 = vsel %vm529_vm14, %v528_v53, 0 }
 0x231   : > { %543 = vmatpush.bf16.xpose.msra.mxu1 %v534_v54 }
 0x237   : > { %v553_v55 = vpop.permute.xlu2 %552 }
 0x238   : > { %2186 = vmatmul.msk.bf16.vlgmr.msra.gmra.mxu1 %vm529_vm14, %v520_v30  ;;  %v558_v56 = vsel %vm529_vm14, %v553_v55, 0 }
 0x239   : > { %567 = vmatpush.bf16.xpose.msra.mxu2 %v558_v56 }
 0x240   : > { %2187 = vmatmul.msk.bf16.vlgmr.msra.gmra.mxu2 %vm529_vm14, %v521_v44 }
 0x24c   : > { %v577_v57 = vpop.permute.xlu0 %576 }
 0x24d   : > { %v582_v58 = vsel %vm529_vm14, %v577_v57, 0 }
 0x24e   : > { %591 = vmatpush.bf16.xpose.msrb.mxu3 %v582_v58 }
 0x254   : > { %v601_v59 = vpop.permute.xlu1 %600 }
 0x255   : > { %2188 = vmatmul.msk.bf16.vlgmr.msrb.gmra.mxu3 %vm529_vm14, %v522_v40  ;;  %v606_v60 = vsel %vm529_vm14, %v601_v59, 0 }
 0x256   : > { %615 = vmatpush.bf16.xpose.msrb.mxu1 %v606_v60 }
 0x25c   : > { %v709_v61 = vpop.permute.xlu1 %708 }
 0x25d   : > { %2189 = vmatmul.msk.bf16.vlgmr.msrb.gmra.mxu1 %vm529_vm14, %v523_v50  ;;  %v714_v62 = vsel %vm670_vm15, %v709_v61, 0 }
 0x25e   : > { %723 = vmatpush.bf16.msrb.mxu0 %v714_v62 }
 0x264   : > { %v730_v63 = vpop.permute.xlu1 %729 }
 0x265   : > { %v735_v0 = vsel %vm670_vm15, %v730_v63, 0 }
 0x266   : > { %744 = vmatpush.bf16.msra.mxu1 %v735_v0 }
 0x26c   : > { %v805_v1 = vpop.permute.xlu1 %804 }
 0x26d   : > { %v810_v2 = vsel %vm529_vm14, %v805_v1, 0 }
 0x26e   : > { %819 = vmatpush.bf16.xpose.msra.mxu0 %v810_v2 }
 0x274   : > { %v828_v3 = vpop.permute.xlu1 %827 }
 0x275   : > { %v833_v4 = vsel %vm529_vm14, %v828_v3, 0 }
 0x276   : > { %842 = vmatpush.bf16.xpose.msrb.mxu1 %v833_v4 }
 0x27c   : > { %v803_v18 = vpop.permute.xlu1 %802 }
 0x2b5   : > { %v545_v5 = vpop.f32.mrf.mxu1 }
 0x2b6   : > { %v621_v6 = vsel %vm529_vm14, %v545_v5, -inf }
 0x2b7   : > { %622 = vmax.xlane.f32.xlu1 %v621_v6 }
 0x2bd   : > { %v547_v7 = vpop.f32.mrf.mxu1 }
 0x2c3   : > { %v569_v8 = vpop.f32.mrf.mxu2 }
 0x2c4   : > { %v624_v17 = vsel %vm529_vm14, %v569_v8, -inf }
 0x2cb   : > { %v571_v9 = vpop.f32.mrf.mxu2 }
 0x2d0   : > { %955 = vrot.lane.b32.xlu1 %v2872_v52, %s2634_s11 }
 0x2d8   : > { %v593_v10 = vpop.f32.mrf.mxu3 }
 0x2d9   : > { %v627_v11 = vsel %vm529_vm14, %v593_v10, -inf }
 0x2da   : > { %628 = vmax.xlane.f32.xlu0 %v627_v11  ;;  %v617_v12 = vpop.f32.mrf.mxu1 }
 0x2db   : > { %v630_v13 = vsel %vm529_vm14, %v617_v12, -inf }
 0x2dc   : > { %631 = vmax.xlane.f32.xlu2 %v630_v13 }
 0x2e0   : > { %v595_v15 = vpop.f32.mrf.mxu3 }
 0x2e2   : > { %v619_v16 = vpop.f32.mrf.mxu1 }
 0x2e4   : > { %625 = vmax.xlane.f32.xlu2 %v624_v17 }
 0x2ee   : > { %825 = vrot.lane.b32.xlu0 %v2872_v52, %s2633_s20 }
 0x2f6   : > { %687 = vrot.lane.b32.xlu0 %v2869_v49, %s2631_s10 }
 0x2fc   : > { %665 = vrot.lane.b32.xlu2 %v2863_v39, %s2631_s10 }
 0x2fe   : > { %758 = vrot.lane.b32.xlu0 %v2863_v39, %s2632_s13 }
 0x304   : > { %781 = vrot.lane.b32.xlu2 %v2869_v49, %s2632_s13 }
 0x306   : > { %756 = vrot.lane.b32.xlu0 %v2863_v39, %s2633_s20 }
 0x30c   : > { %779 = vrot.lane.b32.xlu2 %v2869_v49, %s2633_s20  ;;  %s2067_s20 = scalar_lea.hbm %s3398_s8, %s2272_s25 }
 0x30d   : > { %s2070_s9 = sshll.u32 %s2067_s20, 4  ;;  %s2071_s9 = int_to_ptr.hbm [resolvable:$true] %s2070_s9 }
 0x314   : > { %934 = vrot.lane.b32.xlu2 %v2866_v45, %s2634_s11 }
 0x31c   : > { %1040 = vrot.lane.b32.xlu2 %v2863_v39, %s2635_s1 }
 0x324   : > { %1063 = vrot.lane.b32.xlu2 %v2869_v49, %s2635_s1 }
 0x32a   : > { %v623_v22 = vpop.xlane.xlu1 %622 }
 0x32b   : > { %v633_v19 = vsub.f32 %v545_v5, %v623_v22 }
 0x32c   : > { %1038 = vrot.lane.b32.xlu2 %v2863_v39, %s2636_s14 }
 0x32d   : > { %v637_v28 = vmul.f32 1.442695, %v633_v19 }
 0x334   : > { %1086 = vrot.lane.b32.xlu2 %v2866_v45, %s2635_s1 }
 0x33c   : > { %1107 = vrot.lane.b32.xlu2 %v2872_v52, %s2636_s14 }
 0x342   : > { %v956_v29 = vpop.permute.xlu1 %955 }
 0x343   : > { %v961_v30 = vsel %vm670_vm15, %v956_v29, 0 }
 0x34d   : > { %v629_v21 = vpop.xlane.xlu0 %628 }
 0x34e   : > { %v635_v23 = vsub.f32 %v593_v10, %v629_v21 }
 0x34f   : > { %v632_v24 = vpop.xlane.xlu2 %631 }
 0x350   : > { %v641_v25 = vmul.f32 1.442695, %v635_v23  ;;  %v636_v26 = vsub.f32 %v617_v12, %v632_v24 }
 0x352   : > { %2370 = vpow2.f32 %v641_v25  ;;  %v643_v27 = vmul.f32 1.442695, %v636_v26 }
 0x354   : > { %2372 = vpow2.f32 %v643_v27 }
 0x355   : > { %2374 = vpow2.f32 %v637_v28 }
 0x357   : > { %v626_v31 = vpop.xlane.xlu2 %625 }
 0x358   : > { %v2929_v20 = vpop.eup %2370  ;;  %v634_v34 = vsub.f32 %v569_v8, %v626_v31 }
 0x359   : > { %v663_v32 = vpack.c.bf16 %v2929_v20, %v2929_v20 }
 0x35a   : > { %v2933_v33 = vpop.eup %2372  ;;  %v639_v36 = vmul.f32 1.442695, %v634_v34 }
 0x35b   : > { %v664_v35 = vpack.c.bf16 %v2933_v33, %v2933_v33  ;;  %2192 = vmatmul.msk.bf16.vlgmr.msrb.gmra.mxu0 %vm529_vm14, %v663_v32  ;;  %v2940_v37 = vpop.eup %2374  ;;  %v654_v24 = vsel %vm529_vm14, %v2933_v33, 0.0 }
 0x35c   : > { %2376 = vpow2.f32 %v639_v36  ;;  %v661_v42 = vpack.c.bf16 %v2940_v37, %v2940_v37  ;;  %v645_v22 = vsel %vm529_vm14, %v2940_v37, 0.0 }
 0x35d   : > { %2193 = vmatmul.msk.bf16.vlgmr.msra.gmra.mxu1 %vm529_vm14, %v664_v35 }
 0x35e   : > { %970 = vmatpush.bf16.msra.mxu1 %v961_v30 }
 0x35f   : > { %v666_v38 = vpop.permute.xlu2 %665 }
 0x360   : > { %v826_v40 = vpop.permute.xlu0 %825  ;;  %v672_v41 = vsel %vm670_vm15, %v666_v38, 0 }
 0x361   : > { %681 = vmatpush.bf16.msrb.mxu2 %v672_v41 }
 0x362   : > { %v2377_v44 = vpop.eup %2376 }
 0x363   : > { %v662_v50 = vpack.c.bf16 %v2377_v44, %v2377_v44  ;;  %v648_v23 = vsel %vm529_vm14, %v2377_v44, 0.0 }
 0x364   : > { %2190 = vmatmul.msk.bf16.vlgmr.msrb.gmra.mxu2 %vm529_vm14, %v661_v42 }
 0x367   : > { %v782_v43 = vpop.permute.xlu2 %781 }
 0x368   : > { %v688_v46 = vpop.permute.xlu0 %687  ;;  %v787_v48 = vsel %vm529_vm14, %v782_v43, 0 }
 0x369   : > { %v693_v47 = vsel %vm670_vm15, %v688_v46, 0 }
 0x36a   : > { %702 = vmatpush.bf16.msra.mxu3 %v693_v47 }
 0x36b   : > { %2196 = vmatmul.msk.bf16.vlgmr.msra.gmra.mxu0 %vm529_vm14, %v803_v18  ;;  %v651_v18 = vsel %vm529_vm14, %v2929_v20, 0.0 }
 0x36d   : > { %2191 = vmatmul.msk.bf16.vlgmr.msra.gmra.mxu3 %vm529_vm14, %v662_v50  ;;  %2197 = vmatmul.msk.bf16.vlgmr.msrb.gmra.mxu1 %vm529_vm14, %v826_v40 }
 0x36e   : > { %796 = vmatpush.bf16.xpose.msrb.mxu3 %v787_v48 }
 0x36f   : > { %v780_v51 = vpop.permute.xlu2 %779 }
 0x370   : > { %v759_v53 = vpop.permute.xlu0 %758 }
 0x371   : > { %v764_v54 = vsel %vm529_vm14, %v759_v53, 0 }
 0x372   : > { %773 = vmatpush.bf16.xpose.msra.mxu2 %v764_v54 }
 0x377   : > { %v935_v55 = vpop.permute.xlu2 %934 }
 0x378   : > { %v940_v56 = vsel %vm670_vm15, %v935_v55, 0  ;;  %v757_v57 = vpop.permute.xlu0 %756 }
 0x379   : > { %2194 = vmatmul.msk.bf16.vlgmr.msra.gmra.mxu2 %vm529_vm14, %v757_v57  ;;  %949 = vmatpush.bf16.msrb.mxu0 %v940_v56 }
 0x37d   : > { %2195 = vmatmul.msk.bf16.vlgmr.msrb.gmra.mxu3 %vm529_vm14, %v780_v51 }
 0x37f   : > { %v1041_v58 = vpop.permute.xlu2 %1040 }
 0x380   : > { %v1046_v59 = vsel %vm529_vm14, %v1041_v58, 0  ;;  %v516_v58 = vld [vmem:[%s3394_s4] sm:$0xf] }
 0x381   : > { %1055 = vmatpush.bf16.xpose.msra.mxu0 %v1046_v59  ;;  %v1017_v59 = vsel %vm670_vm15, %v516_v58, 0 }
 0x387   : > { %v1064_v60 = vpop.permute.xlu2 %1063 }
 0x388   : > { %v1069_v61 = vsel %vm529_vm14, %v1064_v60, 0 }
 0x389   : > { %1078 = vmatpush.bf16.xpose.msrb.mxu1 %v1069_v61 }
 0x38f   : > { %v1039_v25 = vpop.permute.xlu2 %1038 }
 0x397   : > { %v1087_v32 = vpop.permute.xlu2 %1086 }
 0x398   : > { %v1092_v35 = vsel %vm529_vm14, %v1087_v32, 0 }
 0x39f   : > { %v1108_v36 = vpop.permute.xlu2 %1107 }
 0x3d8   : > { %v2957_v62 = vpop.f32.mrf.mxu0 }
 0x3da   : > { %v2959_v63 = vpop.f32.mrf.mxu1 }
 0x3e0   : > { %v727_v0 = vpop.f32.mrf.mxu0 }
 0x3e2   : > { %v748_v1 = vpop.f32.mrf.mxu1 }
 0x3e7   : > { %v2961_v2 = vpop.f32.mrf.mxu2 }
 0x3e8   : > { %v821_v3 = vpop.f32.mrf.mxu0 }
 0x3e9   : > { %v854_v4 = vsel %vm529_vm14, %v821_v3, -inf }
 0x3ea   : > { %855 = vmax.xlane.f32.xlu0 %v854_v4  ;;  %v844_v5 = vpop.f32.mrf.mxu1 }
 0x3eb   : > { %v857_v6 = vsel %vm529_vm14, %v844_v5, -inf }
 0x3ec   : > { %858 = vmax.xlane.f32.xlu1 %v857_v6 }
 0x3ef   : > { %v685_v7 = vpop.f32.mrf.mxu2 }
 0x3f0   : > { %v2965_v8 = vpop.f32.mrf.mxu3  ;;  %v823_v9 = vpop.f32.mrf.mxu0 }
 0x3f2   : > { %v846_v10 = vpop.f32.mrf.mxu1 }
 0x3f8   : > { %v706_v11 = vpop.f32.mrf.mxu3 }
 0x3fc   : > { %v2967_v12 = vpop.f32.mrf.mxu2 }
 0x3fd   : > { %v848_v21 = vsel %vm529_vm14, %v2967_v12, -inf }
 0x3fe   : > { %1084 = vrot.lane.b32.xlu0 %v2866_v45, %s2636_s14 }
 0x400   : > { %v798_v13 = vpop.f32.mrf.mxu3 }
 0x401   : > { %v851_v15 = vsel %vm529_vm14, %v798_v13, -inf }
 0x402   : > { %852 = vmax.xlane.f32.xlu2 %v851_v15 }
 0x404   : > { %v777_v16 = vpop.f32.mrf.mxu2 }
 0x405   : > { %1061 = vrot.lane.b32.xlu1 %v2869_v49, %s2636_s14 }
 0x406   : > { %892 = vrot.lane.b32.xlu0 %v2863_v39, %s2634_s11 }
 0x408   : > { %v800_v17 = vpop.f32.mrf.mxu3 }
 0x40a   : > { %652 = vadd.xlane.f32.xlu2 %v651_v18 }
 0x40d   : > { %1109 = vrot.lane.b32.xlu1 %v2872_v52, %s2635_s1  ;;  %s2567_s1 = sshra.s32 %s2071_s9, 4  ;;  %s2568_s1 = int_to_ptr.hbm [resolvable:$true] %s2567_s1 }
 0x40e   : > { %913 = vrot.lane.b32.xlu0 %v2869_v49, %s2634_s11  ;;  %s2056_s11 = scalar_lea.sflag [#allocation4], %s2788_s23  ;;  %s2569_s14 = scalar_lea.hbm %s2568_s1, 32 }
 0x40f   : > { %p2570_p4 = scmp.ne.s32.totalorder %s2568_s1, %s2569_s14  ;;  %p2574_p0 = scmp.lt.s32.totalorder %s2568_s1, %s3398_s8 }
 0x411   : > { %p2571_p6 = pnand %p2570_p4, %p2740_p11 }
 0x413   : > { %p2572_p13 = pneg %p2571_p6 }
 0x422   : > { %1216 = vrot.lane.b32.xlu2 %v2866_v45, %s2637_s21 }
 0x437   : > { %849 = vmax.xlane.f32.xlu1 %v848_v21 }
 0x438   : > { %646 = vadd.xlane.f32.xlu0 %v645_v22 }
 0x43f   : > { %649 = vadd.xlane.f32.xlu1 %v648_v23 }
 0x447   : > { %655 = vadd.xlane.f32.xlu1 %v654_v24 }
 0x44c   : > { %1296 = vrot.lane.b32.xlu0 %v2863_v39, %s2638_s18 }
 0x45d   : > { %v856_v26 = vpop.xlane.xlu0 %855 }
 0x45e   : > { %v862_v19 = vsub.f32 %v821_v3, %v856_v26 }
 0x45f   : > { %v859_v27 = vpop.xlane.xlu1 %858 }
 0x460   : > { %v868_v28 = vmul.f32 1.442695, %v862_v19  ;;  %v863_v31 = vsub.f32 %v844_v5, %v859_v27  ;;  %1195 = vrot.lane.b32.xlu1 %v2869_v49, %s2637_s21 }
 0x462   : > { %2378 = vpow2.f32 %v868_v28  ;;  %v870_v20 = vmul.f32 1.442695, %v863_v31 }
 0x464   : > { %2380 = vpow2.f32 %v870_v20 }
 0x468   : > { %v2995_v29 = vpop.eup %2378  ;;  %1298 = vrot.lane.b32.xlu1 %v2863_v39, %s2639_s6 }
 0x469   : > { %v890_v33 = vpack.c.bf16 %v2995_v29, %v2995_v29 }
 0x46a   : > { %v3001_v34 = vpop.eup %2380 }
 0x46b   : > { %v891_v30 = vpack.c.bf16 %v3001_v34, %v3001_v34  ;;  %2200 = vmatmul.msk.bf16.vlgmr.msrb.gmra.mxu0 %vm529_vm14, %v890_v33  ;;  %v881_v15 = vsel %vm529_vm14, %v3001_v34, 0.0 }
 0x46c   : > { %1101 = vmatpush.bf16.xpose.msrb.mxu0 %v1092_v35 }
 0x46d   : > { %2201 = vmatmul.msk.bf16.vlgmr.msra.gmra.mxu1 %vm529_vm14, %v891_v30 }
 0x470   : > { %v1085_v37 = vpop.permute.xlu0 %1084  ;;  %1237 = vrot.lane.b32.xlu1 %v2872_v52, %s2637_s21 }
 0x475   : > { %v853_v38 = vpop.xlane.xlu2 %852 }
 0x476   : > { %v861_v40 = vsub.f32 %v798_v13, %v853_v38 }
 0x477   : > { %v1062_v41 = vpop.permute.xlu1 %1061 }
 0x478   : > { %v866_v42 = vmul.f32 1.442695, %v861_v40  ;;  %v893_v43 = vpop.permute.xlu0 %892  ;;  %1321 = vrot.lane.b32.xlu1 %v2869_v49, %s2639_s6 }
 0x479   : > { %v898_v44 = vsel %vm670_vm15, %v893_v43, 0 }
 0x47a   : > { %2382 = vpow2.f32 %v866_v42  ;;  %907 = vmatpush.bf16.msrb.mxu2 %v898_v44 }
 0x47b   : > { %2206 = vmatmul.msk.bf16.vlgmr.msra.gmra.mxu0 %vm529_vm14, %v1039_v25 }
 0x47d   : > { %2207 = vmatmul.msk.bf16.vlgmr.msrb.gmra.mxu1 %vm529_vm14, %v1062_v41  ;;  %v653_v46 = vpop.xlane.xlu2 %652  ;;  %v878_v41 = vsel %vm529_vm14, %v2995_v29, 0.0 }
 0x47f   : > { %v1110_v47 = vpop.permute.xlu1 %1109 }
 0x480   : > { %v2383_v48 = vpop.eup %2382  ;;  %v1115_v50 = vsel %vm529_vm14, %v1110_v47, 0  ;;  %v914_v51 = vpop.permute.xlu0 %913  ;;  %1367 = vrot.lane.b32.xlu1 %v2872_v52, %s2639_s6 }
 0x481   : > { %v919_v53 = vsel %vm670_vm15, %v914_v51, 0  ;;  %1124 = vmatpush.bf16.xpose.msra.mxu1 %v1115_v50  ;;  %v875_v54 = vsel %vm529_vm14, %v2383_v48, 0.0  ;;  %v889_v55 = vpack.c.bf16 %v2383_v48, %v2383_v48 }
 0x482   : > { %928 = vmatpush.bf16.msra.mxu3 %v919_v53  ;;  %876 = vadd.xlane.f32.xlu2 %v875_v54  ;;  %v517_v53 = vld [vmem:[%s3394_s4 + $0x4] sm:$0xf] }
 0x483   : > { %v989_v29 = vsel %vm670_vm15, %v517_v53, 0 }
 0x484   : > { %998 = vmatpush.bf16.msra.mxu2 %v989_v29 }
 0x485   : > { %2199 = vmatmul.msk.bf16.vlgmr.msra.gmra.mxu3 %vm529_vm14, %v889_v55  ;;  %v1217_v56 = vpop.permute.xlu2 %1216 }
 0x486   : > { %v1222_v57 = vsel %vm670_vm15, %v1217_v56, 0  ;;  %1026 = vmatpush.bf16.msrb.mxu3 %v1017_v59 }
 0x487   : > { %1231 = vmatpush.bf16.msra.mxu0 %v1222_v57 }
 0x488   : > { %1319 = vrot.lane.b32.xlu1 %v2869_v49, %s2638_s18 }
 0x48b   : > { %2208 = vmatmul.msk.bf16.vlgmr.msrb.gmra.mxu0 %vm529_vm14, %v1085_v37 }
 0x48d   : > { %2209 = vmatmul.msk.bf16.vlgmr.msra.gmra.mxu1 %vm529_vm14, %v1108_v36 }
 0x490   : > { %1344 = vrot.lane.b32.xlu1 %v2866_v45, %s2639_s6  ;;  %s2573_s6 = scalar_lea.hbm %s3398_s8, 64 }
 0x491   : > { %p2575_p7 = scmp.lt.s32.totalorder %s2573_s6, %s2569_s14 }
 0x493   : > { %p2576_p5 = por %p2575_p7, %p2574_p0 }
 0x495   : > { %p2577_p8 = pnand %p2576_p5, %p2572_p13 }
 0x498   : > { %1365 = vrot.lane.b32.xlu1 %v2872_v52, %s2638_s18 }
 0x4aa   : > { %v850_v60 = vpop.xlane.xlu1 %849 }
 0x4ab   : > { %v860_v61 = vsub.f32 %v2967_v12, %v850_v60  ;;  %v647_v1 = vpop.xlane.xlu0 %646 }
 0x4ad   : > { %v864_v0 = vmul.f32 1.442695, %v860_v61 }
 0x4af   : > { %2384 = vpow2.f32 %v864_v0 }
 0x4b0   : > { %2386 = vrcp.f32 %v647_v1 }
 0x4b2   : > { %v650_v3 = vpop.xlane.xlu1 %649 }
 0x4b3   : > { %2388 = vrcp.f32 %v650_v3 }
 0x4b5   : > { %v2385_v4 = vpop.eup %2384 }
 0x4b6   : > { %v888_v5 = vpack.c.bf16 %v2385_v4, %v2385_v4  ;;  %v872_v6 = vsel %vm529_vm14, %v2385_v4, 0.0  ;;  %v2387_v7 = vpop.eup %2386 }
 0x4b7   : > { %873 = vadd.xlane.f32.xlu0 %v872_v6  ;;  %v750_v10 = vmul.f32 %v2387_v7, %v2961_v2 }
 0x4b8   : > { %2198 = vmatmul.msk.bf16.vlgmr.msrb.gmra.mxu2 %vm529_vm14, %v888_v5 }
 0x4b9   : > { %v2389_v9 = vpop.eup %2388 }
 0x4ba   : > { %v751_v11 = vmul.f32 %v2389_v9, %v2965_v8  ;;  %v656_v13 = vpop.xlane.xlu1 %655 }
 0x4bb   : > { %2390 = vrcp.f32 %v656_v13 }
 0x4bc   : > { %v754_v12 = vpack.c.bf16 %v751_v11, %v750_v10  ;;  %2392 = vrcp.f32 %v653_v46 }
 0x4be   : > { %2204 = vmatmul.msk.bf16.vlgmr.msrb.gmra.mxu3 %vm529_vm14, %v754_v12  ;;  %v1297_v54 = vpop.permute.xlu0 %1296 }
 0x4bf   : > { %882 = vadd.xlane.f32.xlu0 %v881_v15 }
 0x4c1   : > { %v2391_v16 = vpop.eup %2390 }
 0x4c2   : > { %v2393_v17 = vpop.eup %2392  ;;  %v753_v18 = vmul.f32 %v2391_v16, %v2959_v63 }
 0x4c3   : > { %v752_v21 = vmul.f32 %v2393_v17, %v2957_v62 }
 0x4c5   : > { %v755_v22 = vpack.c.bf16 %v753_v18, %v752_v21 }
 0x4ce   : > { %2205 = vmatmul.msk.bf16.gmra.mxu3 %vm529_vm14, %v755_v22 }
 0x4d2   : > { %v1196_v2 = vpop.permute.xlu1 %1195 }
 0x4d3   : > { %v1201_v8 = vsel %vm670_vm15, %v1196_v2, 0 }
 0x4d4   : > { %1210 = vmatpush.bf16.msra.mxu3 %v1201_v8 }
 0x4da   : > { %v1299_v23 = vpop.permute.xlu1 %1298 }
 0x4db   : > { %v1304_v24 = vsel %vm529_vm14, %v1299_v23, 0 }
 0x4dc   : > { %1313 = vmatpush.bf16.xpose.msrb.mxu3 %v1304_v24 }
 0x4e2   : > { %v1238_v25 = vpop.permute.xlu1 %1237 }
 0x4e3   : > { %v1243_v26 = vsel %vm670_vm15, %v1238_v25, 0 }
 0x4e4   : > { %1252 = vmatpush.bf16.msrb.mxu1 %v1243_v26 }
 0x4e8   : > { %v3048_v19 = vpop.f32.mrf.mxu0 }
 0x4ea   : > { %v3050_v63 = vpop.f32.mrf.mxu1  ;;  %v1322_v62 = vpop.permute.xlu1 %1321 }
 0x4eb   : > { %v1327_v27 = vsel %vm529_vm14, %v1322_v62, 0 }
 0x4ec   : > { %1336 = vmatpush.bf16.xpose.msrb.mxu0 %v1327_v27 }
 0x4f0   : > { %v953_v28 = vpop.f32.mrf.mxu0 }
 0x4f2   : > { %v974_v31 = vpop.f32.mrf.mxu1  ;;  %v3053_v20 = vpop.permute.xlu1 %1367 }
 0x4f3   : > { %v1373_v22 = vsel %vm529_vm14, %v3053_v20, 0 }
 0x4f5   : > { %v877_v55 = vpop.xlane.xlu2 %876 }
 0x4f6   : > { %2394 = vrcp.f32 %v877_v55 }
 0x4f8   : > { %v1057_v32 = vpop.f32.mrf.mxu0 }
 0x4f9   : > { %v1130_v33 = vsel %vm529_vm14, %v1057_v32, -inf }
 0x4fa   : > { %v3056_v34 = vpop.permute.xlu1 %1319  ;;  %v1080_v35 = vpop.f32.mrf.mxu1  ;;  %1131 = vmax.xlane.f32.xlu1 %v1130_v33 }
 0x4fb   : > { %v1133_v30 = vsel %vm529_vm14, %v1080_v35, -inf }
 0x4fc   : > { %1134 = vmax.xlane.f32.xlu2 %v1133_v30  ;;  %v2395_v57 = vpop.eup %2394 }
 0x500   : > { %v1059_v36 = vpop.f32.mrf.mxu0 }
 0x502   : > { %v1345_v37 = vpop.permute.xlu1 %1344  ;;  %v1082_v38 = vpop.f32.mrf.mxu1 }
 0x503   : > { %v1350_v40 = vsel %vm529_vm14, %v1345_v37, 0 }
 0x504   : > { %1359 = vmatpush.bf16.xpose.msra.mxu1 %v1350_v40  ;;  %879 = vadd.xlane.f32.xlu2 %v878_v41 }
 0x508   : > { %v930_v42 = vpop.f32.mrf.mxu3  ;;  %v1103_v43 = vpop.f32.mrf.mxu0 }
 0x509   : > { %v1136_v47 = vsel %vm529_vm14, %v1103_v43, -inf  ;;  %v977_v60 = vmul.f32 %v2395_v57, %v930_v42 }
 0x50a   : > { %v1126_v44 = vpop.f32.mrf.mxu1  ;;  %v1366_v3 = vpop.permute.xlu1 %1365 }
 0x50b   : > { %v1139_v46 = vsel %vm529_vm14, %v1126_v44, -inf }
 0x50c   : > { %1140 = vmax.xlane.f32.xlu0 %v1139_v46  ;;  %1137 = vmax.xlane.f32.xlu2 %v1136_v47 }
 0x510   : > { %v932_v48 = vpop.f32.mrf.mxu3  ;;  %v1105_v50 = vpop.f32.mrf.mxu0 }
 0x512   : > { %v1128_v51 = vpop.f32.mrf.mxu1 }
 0x520   : > { %1174 = vrot.lane.b32.xlu0 %v2863_v39, %s2637_s21 }
 0x524   : > { %1342 = vrot.lane.b32.xlu2 %v2866_v45, %s2638_s18 }
 0x52a   : > { %v874_v56 = vpop.xlane.xlu0 %873 }
 0x52b   : > { %2396 = vrcp.f32 %v874_v56 }
 0x531   : > { %v2397_v58 = vpop.eup %2396 }
 0x532   : > { %v883_v11 = vpop.xlane.xlu0 %882 }
 0x53b   : > { %v909_v59 = vpop.f32.mrf.mxu2 }
 0x53c   : > { %v976_v61 = vmul.f32 %v2397_v58, %v909_v59 }
 0x53e   : > { %v980_v0 = vpack.c.bf16 %v977_v60, %v976_v61 }
 0x540   : > { %2202 = vmatmul.msk.bf16.vlgmr.msra.gmra.mxu2 %vm529_vm14, %v980_v0 }
 0x541   : > { %v3094_v40 = vpop.f32.mrf.mxu3 }
 0x543   : > { %v911_v1 = vpop.f32.mrf.mxu2 }
 0x549   : > { %v3100_v42 = vpop.f32.mrf.mxu3 }
 0x56d   : > { %v1132_v4 = vpop.xlane.xlu1 %1131 }
 0x56e   : > { %v1142_v5 = vsub.f32 %v1057_v32, %v1132_v4 }
 0x56f   : > { %v1135_v6 = vpop.xlane.xlu2 %1134 }
 0x570   : > { %v1146_v7 = vmul.f32 1.442695, %v1142_v5  ;;  %v1143_v9 = vsub.f32 %v1080_v35, %v1135_v6 }
 0x572   : > { %2398 = vpow2.f32 %v1146_v7  ;;  %v1148_v10 = vmul.f32 1.442695, %v1143_v9 }
 0x574   : > { %2400 = vpow2.f32 %v1148_v10 }
 0x575   : > { %2402 = vrcp.f32 %v883_v11 }
 0x577   : > { %v880_v12 = vpop.xlane.xlu2 %879 }
 0x578   : > { %v2399_v13 = vpop.eup %2398  ;;  %2404 = vrcp.f32 %v880_v12 }
 0x579   : > { %v1154_v15 = vsel %vm529_vm14, %v2399_v13, 0.0  ;;  %v1170_v37 = vpack.c.bf16 %v2399_v13, %v2399_v13 }
 0x57a   : > { %v2401_v16 = vpop.eup %2400  ;;  %1155 = vadd.xlane.f32.xlu2 %v1154_v15 }
 0x57b   : > { %v1171_v17 = vpack.c.bf16 %v2401_v16, %v2401_v16  ;;  %v1157_v18 = vsel %vm529_vm14, %v2401_v16, 0.0  ;;  %v2403_v21 = vpop.eup %2402 }
 0x57c   : > { %1158 = vadd.xlane.f32.xlu0 %v1157_v18  ;;  %v979_v25 = vmul.f32 %v2403_v21, %v3050_v63 }
 0x57d   : > { %2211 = vmatmul.msk.bf16.vlgmr.msra.gmra.mxu3 %vm529_vm14, %v1171_v17 }
 0x57e   : > { %v2405_v2 = vpop.eup %2404  ;;  %1382 = vmatpush.bf16.xpose.msra.mxu3 %v1373_v22 }
 0x57f   : > { %v1141_v8 = vpop.xlane.xlu0 %1140  ;;  %v1138_v23 = vpop.xlane.xlu2 %1137  ;;  %v978_v24 = vmul.f32 %v2405_v2, %v3048_v19 }
 0x580   : > { %v1145_v26 = vsub.f32 %v1126_v44, %v1141_v8  ;;  %v1144_v62 = vsub.f32 %v1103_v43, %v1138_v23  ;;  %v3102_v43 = vpop.f32.mrf.mxu3 }
 0x581   : > { %v981_v27 = vpack.c.bf16 %v979_v25, %v978_v24 }
 0x582   : > { %v1152_v28 = vmul.f32 1.442695, %v1145_v26  ;;  %v1150_v31 = vmul.f32 1.442695, %v1144_v62 }
 0x583   : > { %2203 = vmatmul.msk.bf16.gmra.mxu2 %vm529_vm14, %v981_v27 }
 0x584   : > { %2406 = vpow2.f32 %v1152_v28 }
 0x585   : > { %2408 = vpow2.f32 %v1150_v31 }
 0x587   : > { %v1343_v38 = vpop.permute.xlu2 %1342 }
 0x588   : > { %v1035_v46 = vpop.f32.mrf.mxu3 }
 0x58a   : > { %v2407_v20 = vpop.eup %2406 }
 0x58b   : > { %v2409_v32 = vpop.eup %2408  ;;  %v1173_v33 = vpack.c.bf16 %v2407_v20, %v2407_v20  ;;  %v1163_v36 = vsel %vm529_vm14, %v2407_v20, 0.0 }
 0x58c   : > { %v1172_v35 = vpack.c.bf16 %v2409_v32, %v2409_v32  ;;  %v1160_v30 = vsel %vm529_vm14, %v2409_v32, 0.0 }
 0x58d   : > { %1161 = vadd.xlane.f32.xlu1 %v1160_v30  ;;  %2213 = vmatmul.msk.bf16.vlgmr.msrb.gmra.mxu1 %vm529_vm14, %v1173_v33 }
 0x58e   : > { %2212 = vmatmul.msk.bf16.vlgmr.msra.gmra.mxu0 %vm529_vm14, %v1172_v35  ;;  %2216 = vmatmul.msk.bf16.vlgmr.msrb.gmra.mxu3 %vm529_vm14, %v1297_v54 }
 0x590   : > { %1474 = vrot.lane.b32.xlu0 %v2866_v45, %s2640_s15  ;;  %v518_v45 = vld [vmem:[%s3394_s4 + $0x8] sm:$0xf] }
 0x591   : > { %v1271_v41 = vsel %vm670_vm15, %v518_v45, 0 }
 0x592   : > { %v1175_v19 = vpop.permute.xlu0 %1174 }
 0x593   : > { %v1180_v63 = vsel %vm670_vm15, %v1175_v19, 0 }
 0x594   : > { %1189 = vmatpush.bf16.msrb.mxu2 %v1180_v63 }
 0x595   : > { %1164 = vadd.xlane.f32.xlu1 %v1163_v36 }
 0x597   : > { %2210 = vmatmul.msk.bf16.vlgmr.msrb.gmra.mxu2 %vm529_vm14, %v1170_v37 }
 0x598   : > { %1280 = vmatpush.bf16.msra.mxu2 %v1271_v41 }
 0x59d   : > { %2218 = vmatmul.msk.bf16.vlgmr.msra.gmra.mxu1 %vm529_vm14, %v1343_v38 }
 0x59e   : > { %2217 = vmatmul.msk.bf16.vlgmr.msrb.gmra.mxu0 %vm529_vm14, %v3056_v34  ;;  %2219 = vmatmul.msk.bf16.vlgmr.msra.gmra.mxu3 %vm529_vm14, %v1366_v3 }
 0x5c3   : > { %v3104_v44 = vpop.f32.mrf.mxu2 }
 0x5cb   : > { %v3106_v34 = vpop.f32.mrf.mxu2 }
 0x5ed   : > { %v1156_v58 = vpop.xlane.xlu2 %1155 }
 0x5ee   : > { %2410 = vrcp.f32 %v1156_v58 }
 0x5ef   : > { %v1159_v47 = vpop.xlane.xlu0 %1158 }
 0x5f0   : > { %2412 = vrcp.f32 %v1159_v47 }
 0x5f4   : > { %v2411_v3 = vpop.eup %2410 }
 0x5f6   : > { %v2413_v5 = vpop.eup %2412 }
 0x600   : > { %v1212_v48 = vpop.f32.mrf.mxu3  ;;  %v1162_v0 = vpop.xlane.xlu1 %1161 }
 0x601   : > { %v1259_v9 = vmul.f32 %v2413_v5, %v1212_v48 }
 0x602   : > { %v1475_v50 = vpop.permute.xlu0 %1474 }
 0x603   : > { %v1480_v51 = vsel %vm670_vm15, %v1475_v50, 0 }
 0x604   : > { %1489 = vmatpush.bf16.msrb.mxu2 %v1480_v51 }
 0x606   : > { %v3109_v53 = vpop.f32.mrf.mxu2 }
 0x608   : > { %v1214_v29 = vpop.f32.mrf.mxu3  ;;  %v1165_v15 = vpop.xlane.xlu1 %1164 }
 0x609   : > { %2414 = vrcp.f32 %v1165_v15  ;;  %v1029_v29 = vadd.f32 %v3094_v40, %v3104_v44  ;;  %v1034_v44 = vadd.f32 %v3102_v43, %v3109_v53 }
 0x60a   : > { %v1254_v54 = vpop.f32.mrf.mxu1  ;;  %2416 = vrcp.f32 %v1162_v0 }
 0x60b   : > { %v1233_v55 = vpop.f32.mrf.mxu0 }
 0x60e   : > { %v1007_v56 = vpop.f32.mrf.mxu2 }
 0x60f   : > { %v3111_v57 = vadd.f32 %v1035_v46, %v1007_v56  ;;  %v2415_v8 = vpop.eup %2414 }
 0x610   : > { %v1261_v23 = vmul.f32 %v2415_v8, %v1254_v54  ;;  %v2417_v25 = vpop.eup %2416 }
 0x611   : > { %v1315_v59 = vpop.f32.mrf.mxu3  ;;  %v1260_v26 = vmul.f32 %v2417_v25, %v1233_v55 }
 0x612   : > { %v1256_v60 = vpop.f32.mrf.mxu1  ;;  %v1388_v61 = vsel %vm529_vm14, %v1315_v59, -inf }
 0x613   : > { %v1235_v1 = vpop.f32.mrf.mxu0  ;;  %1389 = vmax.xlane.f32.xlu1 %v1388_v61  ;;  %v1263_v62 = vpack.c.bf16 %v1261_v23, %v1260_v26 }
 0x619   : > { %v1317_v4 = vpop.f32.mrf.mxu3 }
 0x61a   : > { %v1191_v6 = vpop.f32.mrf.mxu2  ;;  %v1361_v7 = vpop.f32.mrf.mxu1 }
 0x61b   : > { %v1258_v10 = vmul.f32 %v2411_v3, %v1191_v6  ;;  %v1338_v11 = vpop.f32.mrf.mxu0  ;;  %v1394_v12 = vsel %vm529_vm14, %v1361_v7, -inf }
 0x61c   : > { %v1391_v13 = vsel %vm529_vm14, %v1338_v11, -inf  ;;  %1395 = vmax.xlane.f32.xlu2 %v1394_v12 }
 0x61d   : > { %v1262_v16 = vpack.c.bf16 %v1259_v9, %v1258_v10  ;;  %1392 = vmax.xlane.f32.xlu1 %v1391_v13 }
 0x61f   : > { %2214 = vmatmul.msk.bf16.vlgmr.msra.gmra.mxu2 %vm529_vm14, %v1262_v16 }
 0x621   : > { %v1384_v17 = vpop.f32.mrf.mxu3 }
 0x622   : > { %v1397_v18 = vsel %vm529_vm14, %v1384_v17, -inf  ;;  %v1193_v21 = vpop.f32.mrf.mxu2  ;;  %v1363_v22 = vpop.f32.mrf.mxu1 }
 0x623   : > { %1398 = vmax.xlane.f32.xlu0 %v1397_v18  ;;  %v1340_v2 = vpop.f32.mrf.mxu0 }
 0x629   : > { %v1386_v24 = vpop.f32.mrf.mxu3 }
 0x62f   : > { %2215 = vmatmul.msk.bf16.gmra.mxu2 %vm529_vm14, %v1263_v62 }
 0x634   : > { %1453 = vrot.lane.b32.xlu2 %v2869_v49, %s2640_s15 }
 0x636   : > { %1432 = vrot.lane.b32.xlu1 %v2863_v39, %s2640_s15 }
 0x637   : > { %1495 = vrot.lane.b32.xlu0 %v2872_v52, %s2640_s15 }
 0x686   : > { %v1390_v27 = vpop.xlane.xlu1 %1389 }
 0x687   : > { %v1400_v28 = vsub.f32 %v1315_v59, %v1390_v27  ;;  %v1031_v59 = vadd.f32 %v3100_v42, %v3106_v34  ;;  %v519_v34 = vld [vmem:[%s3394_s4 + $0xc] sm:$0xf] }
 0x688   : > { %v1529_v6 = vsel %vm670_vm15, %v519_v34, 0 }
 0x689   : > { %v1404_v31 = vmul.f32 1.442695, %v1400_v28 }
 0x68b   : > { %2418 = vpow2.f32 %v1404_v31 }
 0x68f   : > { %v1396_v20 = vpop.xlane.xlu2 %1395 }
 0x690   : > { %v1393_v32 = vpop.xlane.xlu1 %1392  ;;  %v1402_v33 = vsub.f32 %v1361_v7, %v1396_v20 }
 0x691   : > { %v2419_v35 = vpop.eup %2418  ;;  %v1401_v30 = vsub.f32 %v1338_v11, %v1393_v32  ;;  %v3148_v32 = vld [vmem:[#allocation5] sm:$0xff] }
 0x692   : > { %v1408_v19 = vmul.f32 1.442695, %v1402_v33  ;;  %v1412_v63 = vsel %vm529_vm14, %v2419_v35, 0.0  ;;  %v1428_v3 = vpack.c.bf16 %v2419_v35, %v2419_v35  ;;  %v1558_v33 = vperm.slane %v3148_v32, 2  ;;  %v2459_v35 = vld [vmem:[%s2794_s26] sm:$0xff] }
 0x693   : > { %v1406_v36 = vmul.f32 1.442695, %v1401_v30  ;;  %1413 = vadd.xlane.f32.xlu1 %v1412_v63 }
 0x694   : > { %2420 = vpow2.f32 %v1408_v19 }
 0x695   : > { %2422 = vpow2.f32 %v1406_v36 }
 0x696   : > { %v1399_v39 = vpop.xlane.xlu0 %1398 }
 0x697   : > { %v1403_v49 = vsub.f32 %v1384_v17, %v1399_v39  ;;  %v1454_v37 = vpop.permute.xlu2 %1453 }
 0x698   : > { %v1459_v52 = vsel %vm670_vm15, %v1454_v37, 0 }
 0x699   : > { %v1410_v38 = vmul.f32 1.442695, %v1403_v49  ;;  %1468 = vmatpush.bf16.msrb.mxu1 %v1459_v52  ;;  %v2460_v49 = vld [vmem:[%s2794_s26 + $0x8] sm:$0xff] }
 0x69a   : > { %v2421_v45 = vpop.eup %2420 }
 0x69b   : > { %v2423_v41 = vpop.eup %2422  ;;  %v1430_v46 = vpack.c.bf16 %v2421_v45, %v2421_v45  ;;  %2424 = vpow2.f32 %v1410_v38  ;;  %v1418_v47 = vsel %vm529_vm14, %v2421_v45, 0.0 }
 0x69c   : > { %v1429_v48 = vpack.c.bf16 %v2423_v41, %v2423_v41  ;;  %v1415_v50 = vsel %vm529_vm14, %v2423_v41, 0.0  ;;  %1419 = vadd.xlane.f32.xlu0 %v1418_v47 }
 0x69d   : > { %1416 = vadd.xlane.f32.xlu2 %v1415_v50  ;;  %2222 = vmatmul.msk.bf16.vlgmr.msrb.gmra.mxu2 %vm529_vm14, %v1430_v46  ;;  %v2461_v46 = vld [vmem:[%s2794_s26 + $0x10] sm:$0xff] }
 0x69e   : > { %2221 = vmatmul.msk.bf16.vlgmr.msrb.gmra.mxu1 %vm529_vm14, %v1429_v48 }
 0x6a1   : > { %v2425_v51 = vpop.eup %2424 }
 0x6a2   : > { %v1421_v54 = vsel %vm529_vm14, %v2425_v51, 0.0  ;;  %v1282_v55 = vpop.f32.mrf.mxu2  ;;  %v1431_v40 = vpack.c.bf16 %v2425_v51, %v2425_v51 }
 0x6a3   : > { %1422 = vadd.xlane.f32.xlu1 %v1421_v54  ;;  %v1292_v56 = vadd.f32 %v1282_v55, %v1029_v29  ;;  %v2462_v55 = vld [vmem:[%s2794_s26 + $0x18] sm:$0xff]  ;;  %s2068_s26 = sshll.u32 %s3343_s24, 4  ;;  %s2069_s26 = int_to_ptr.vmem [resolvable:$true] %s2068_s26 }
 0x6a8   : > { %v1433_v58 = vpop.permute.xlu1 %1432 }
 0x6a9   : > { %v1438_v60 = vsel %vm670_vm15, %v1433_v58, 0  ;;  %v1496_v61 = vpop.permute.xlu0 %1495 }
 0x6aa   : > { %v1501_v0 = vsel %vm670_vm15, %v1496_v61, 0  ;;  %1447 = vmatpush.bf16.msra.mxu0 %v1438_v60  ;;  %v1284_v1 = vpop.f32.mrf.mxu2 }
 0x6ab   : > { %v1293_v4 = vadd.f32 %v1284_v1, %v1031_v59  ;;  %1510 = vmatpush.bf16.msrb.mxu3 %v1501_v0 }
 0x6ad   : > { %2220 = vmatmul.msk.bf16.vlgmr.msra.gmra.mxu0 %vm529_vm14, %v1428_v3 }
 0x6ae   : > { %2223 = vmatmul.msk.bf16.vlgmr.msrb.gmra.mxu3 %vm529_vm14, %v1431_v40  ;;  %1538 = vmatpush.bf16.msrb.mxu0 %v1529_v6 }
 0x6b2   : > { %v1287_v5 = vpop.f32.mrf.mxu2 }
 0x6b3   : > { %v1294_v42 = vadd.f32 %v1287_v5, %v1034_v44 }
 0x6ba   : > { %v1289_v7 = vpop.f32.mrf.mxu2 }
 0x6bb   : > { %v1295_v50 = vadd.f32 %v1289_v7, %v3111_v57 }
 0x706   : > { %v1414_v10 = vpop.xlane.xlu1 %1413 }
 0x707   : > { %2426 = vrcp.f32 %v1414_v10 }
 0x70d   : > { %v2427_v16 = vpop.eup %2426 }
 0x70f   : > { %v1420_v2 = vpop.xlane.xlu0 %1419 }
 0x710   : > { %v1417_v12 = vpop.xlane.xlu2 %1416 }
 0x711   : > { %2428 = vrcp.f32 %v1417_v12 }
 0x716   : > { %v1423_v22 = vpop.xlane.xlu1 %1422 }
 0x717   : > { %v2429_v43 = vpop.eup %2428  ;;  %2430 = vrcp.f32 %v1423_v22 }
 0x718   : > { %2432 = vrcp.f32 %v1420_v2 }
 0x71b   : > { %v1470_v9 = vpop.f32.mrf.mxu1 }
 0x71c   : > { %v1517_v17 = vmul.f32 %v2429_v43, %v1470_v9 }
 0x71d   : > { %v2431_v24 = vpop.eup %2430 }
 0x71e   : > { %v2433_v62 = vpop.eup %2432 }
 0x720   : > { %v1491_v11 = vpop.f32.mrf.mxu2 }
 0x721   : > { %v1518_v27 = vmul.f32 %v2433_v62, %v1491_v11 }
 0x723   : > { %v1472_v13 = vpop.f32.mrf.mxu1 }
 0x728   : > { %v1493_v15 = vpop.f32.mrf.mxu2 }
 0x72a   : > { %v1449_v53 = vpop.f32.mrf.mxu0 }
 0x72b   : > { %v1516_v18 = vmul.f32 %v2427_v16, %v1449_v53  ;;  %v2267_v16 = vld [vmem:[%s3395_s5 + $0x8] sm:$0xff] }
 0x72c   : > { %1695 = vmatpush.bf16.msra.mxu1 %v2267_v16 }
 0x72d   : > { %v1520_v21 = vpack.c.bf16 %v1517_v17, %v1516_v18  ;;  %v2266_v17 = vld [vmem:[%s3395_s5] sm:$0xff] }
 0x72f   : > { %2224 = vmatmul.msk.bf16.vlgmr.msrb.gmra.mxu0 %vm529_vm14, %v1520_v21 }
 0x730   : > { %1696 = vmatpush.bf16.msra.mxu1 %v2266_v17 }
 0x731   : > { %v1512_v8 = vpop.f32.mrf.mxu3 }
 0x732   : > { %v1451_v23 = vpop.f32.mrf.mxu0  ;;  %v1519_v25 = vmul.f32 %v2431_v24, %v1512_v8 }
 0x734   : > { %v1521_v28 = vpack.c.bf16 %v1519_v25, %v1518_v27 }
 0x739   : > { %v1514_v26 = vpop.f32.mrf.mxu3 }
 0x73f   : > { %2225 = vmatmul.msk.bf16.gmra.mxu0 %vm529_vm14, %v1521_v28 }
 0x7ac   : > { %v1540_v31 = vpop.f32.mrf.mxu0 }
 0x7ad   : > { %v1550_v20 = vadd.f32 %v1540_v31, %v1292_v56 }
 0x7af   : > { %v1554_v30 = vadd.f32 %v2459_v35, %v1550_v20 }
 0x7b1   : > { %v3152_v19 = vadd.f32 %v1558_v33, %v1554_v30 }
 0x7b3   : > { %v1563_v63 = vsel %vm363_vm0, %v3152_v19, 0.0 }
 0x7b4   : > { %1564 = vadd.xlane.f32.xlu2 %v1563_v63  ;;  %v1542_v36 = vpop.f32.mrf.mxu0 }
 0x7b5   : > { %v1551_v39 = vadd.f32 %v1542_v36, %v1293_v4 }
 0x7b7   : > { %v1555_v37 = vadd.f32 %v2460_v49, %v1551_v39 }
 0x7b9   : > { %v3157_v52 = vadd.f32 %v1558_v33, %v1555_v37 }
 0x7bb   : > { %v1566_v38 = vsel %vm363_vm0, %v3157_v52, 0.0 }
 0x7bc   : > { %1567 = vadd.xlane.f32.xlu0 %v1566_v38  ;;  %v1545_v45 = vpop.f32.mrf.mxu0  ;;  %v1651_v38 = vperm.slane %v3148_v32, 3 }
 0x7bd   : > { %v1552_v41 = vadd.f32 %v1545_v45, %v1294_v42 }
 0x7bf   : > { %v1556_v47 = vadd.f32 %v2461_v46, %v1552_v41 }
 0x7c1   : > { %v3162_v48 = vadd.f32 %v1558_v33, %v1556_v47 }
 0x7c3   : > { %v1569_v51 = vsel %vm363_vm0, %v3162_v48, 0.0 }
 0x7c4   : > { %1570 = vadd.xlane.f32.xlu1 %v1569_v51  ;;  %v1547_v29 = vpop.f32.mrf.mxu0 }
 0x7c5   : > { %v1553_v54 = vadd.f32 %v1547_v29, %v1295_v50  ;;  %v1656_v29 = vperm.slane %v3148_v32, 4 }
 0x7c7   : > { %v1557_v56 = vadd.f32 %v2462_v55, %v1553_v54 }
 0x7c9   : > { %v3168_v58 = vadd.f32 %v1558_v33, %v1557_v56 }
 0x7cb   : > { %v1572_v59 = vsel %vm363_vm0, %v3168_v58, 0.0 }
 0x7cc   : > { %1573 = vadd.xlane.f32.xlu2 %v1572_v59 }
 0x827   : > { %v1565_v60 = vpop.xlane.xlu2 %1564 }
 0x828   : > { %v1575_v61 = vmul.f32 %v1565_v60, %v2812_v14 }
 0x82a   : > { %v1579_v0 = vsub.f32 %v3152_v19, %v1575_v61 }
 0x82c   : > { %v1583_v57 = vmul.f32 %v1579_v0, %v1579_v0 }
 0x82e   : > { %v1587_v1 = vsel %vm363_vm0, %v1583_v57, 0.0 }
 0x82f   : > { %1588 = vadd.xlane.f32.xlu0 %v1587_v1  ;;  %v1568_v3 = vpop.xlane.xlu0 %1567 }
 0x830   : > { %v1576_v4 = vmul.f32 %v1568_v3, %v2812_v14 }
 0x832   : > { %v3177_v40 = vsub.f32 %v3157_v52, %v1576_v4 }
 0x834   : > { %v1584_v44 = vmul.f32 %v3177_v40, %v3177_v40 }
 0x836   : > { %v1590_v5 = vsel %vm363_vm0, %v1584_v44, 0.0 }
 0x837   : > { %1591 = vadd.xlane.f32.xlu1 %v1590_v5  ;;  %v1571_v42 = vpop.xlane.xlu1 %1570 }
 0x838   : > { %v1577_v34 = vmul.f32 %v1571_v42, %v2812_v14 }
 0x83a   : > { %v3184_v6 = vsub.f32 %v3162_v48, %v1577_v34 }
 0x83c   : > { %v1585_v7 = vmul.f32 %v3184_v6, %v3184_v6 }
 0x83e   : > { %v1593_v9 = vsel %vm363_vm0, %v1585_v7, 0.0 }
 0x83f   : > { %1594 = vadd.xlane.f32.xlu2 %v1593_v9  ;;  %v1574_v10 = vpop.xlane.xlu2 %1573 }
 0x840   : > { %v1578_v11 = vmul.f32 %v1574_v10, %v2812_v14 }
 0x842   : > { %v3191_v12 = vsub.f32 %v3168_v58, %v1578_v11 }
 0x844   : > { %v1586_v13 = vmul.f32 %v3191_v12, %v3191_v12 }
 0x846   : > { %v1596_v15 = vsel %vm363_vm0, %v1586_v13, 0.0 }
 0x847   : > { %1597 = vadd.xlane.f32.xlu0 %v1596_v15 }
 0x8a2   : > { %v1589_v43 = vpop.xlane.xlu0 %1588 }
 0x8a3   : > { %v1599_v53 = vmul.f32 %v1589_v43, %v2812_v14 }
 0x8a5   : > { %v1603_v18 = vadd.f32 1e-06, %v1599_v53  ;;  %v2359_v53 = vld [vmem:[#allocation7] ss:$0 sm:$0xff] }
 0x8a7   : > { %2434 = vrsqrt.f32 %v1603_v18  ;;  %vm1613_vm2 = vweird.f32 %v1603_v18 }
 0x8aa   : > { %v1592_v21 = vpop.xlane.xlu1 %1591 }
 0x8ab   : > { %v1600_v22 = vmul.f32 %v1592_v21, %v2812_v14 }
 0x8ad   : > { %v2435_v2 = vpop.eup %2434  ;;  %v1604_v8 = vadd.f32 1e-06, %v1600_v22 }
 0x8ae   : > { %v1608_v23 = vmul.f32 %v2435_v2, %v1603_v18  ;;  %vm1614_vm1 = vweird.f32 %v2435_v2 }
 0x8af   : > { %2436 = vrsqrt.f32 %v1604_v8  ;;  %vm1615_vm3 = vmor %vm1613_vm2, %vm1614_vm1  ;;  %vm1623_vm5 = vweird.f32 %v1604_v8 }
 0x8b0   : > { %v1609_v24 = vmul.f32 %v2435_v2, %v1608_v23 }
 0x8b2   : > { %v1610_v25 = vmul.f32 0.5, %v1609_v24  ;;  %v1595_v26 = vpop.xlane.xlu2 %1594 }
 0x8b3   : > { %v1601_v62 = vmul.f32 %v1595_v26, %v2812_v14 }
 0x8b4   : > { %v1611_v27 = vsub.f32 1.5, %v1610_v25 }
 0x8b5   : > { %v2437_v28 = vpop.eup %2436  ;;  %v1605_v31 = vadd.f32 1e-06, %v1601_v62 }
 0x8b6   : > { %v1612_v20 = vmul.f32 %v2435_v2, %v1611_v27  ;;  %v1618_v33 = vmul.f32 %v2437_v28, %v1604_v8  ;;  %vm1624_vm4 = vweird.f32 %v2437_v28 }
 0x8b7   : > { %2438 = vrsqrt.f32 %v1605_v31  ;;  %vm1625_vm6 = vmor %vm1623_vm5, %vm1624_vm4  ;;  %vm1633_vm8 = vweird.f32 %v1605_v31 }
 0x8b8   : > { %v1619_v35 = vmul.f32 %v2437_v28, %v1618_v33  ;;  %v1616_v30 = vsel %vm1615_vm3, %v2435_v2, %v1612_v20 }
 0x8b9   : > { %v1647_v45 = vmul.f32 %v1616_v30, %v1579_v0 }
 0x8ba   : > { %v1620_v63 = vmul.f32 0.5, %v1619_v35  ;;  %v1598_v36 = vpop.xlane.xlu0 %1597 }
 0x8bb   : > { %v1602_v39 = vmul.f32 %v1598_v36, %v2812_v14  ;;  %v1652_v54 = vmul.f32 %v1651_v38, %v1647_v45 }
 0x8bc   : > { %v1621_v49 = vsub.f32 1.5, %v1620_v63 }
 0x8bd   : > { %v2439_v37 = vpop.eup %2438  ;;  %v1606_v41 = vadd.f32 1e-06, %v1602_v39  ;;  %v1657_v57 = vadd.f32 %v1656_v29, %v1652_v54 }
 0x8be   : > { %v1622_v46 = vmul.f32 %v2437_v28, %v1621_v49  ;;  %v1628_v47 = vmul.f32 %v2439_v37, %v1605_v31  ;;  %vm1634_vm7 = vweird.f32 %v2439_v37 }
 0x8bf   : > { %2440 = vrsqrt.f32 %v1606_v41  ;;  %vm1635_vm9 = vmor %vm1633_vm8, %vm1634_vm7  ;;  %vm1643_vm11 = vweird.f32 %v1606_v41  ;;  %vm1918_vm7 = vcmask 523264  }
 0x8c0   : > { %v1626_v50 = vsel %vm1625_vm6, %v2437_v28, %v1622_v46  ;;  %v1629_v51 = vmul.f32 %v2439_v37, %v1628_v47  ;;  %v2271_v46 = vld [vmem:[%s3397_s7 + $0x18] sm:$0xff] }
 0x8c1   : > { %v1648_v55 = vmul.f32 %v1626_v50, %v3177_v40  ;;  %1929 = vmatpush.bf16.msra.mxu2 %v2271_v46 }
 0x8c2   : > { %v1630_v56 = vmul.f32 0.5, %v1629_v51 }
 0x8c3   : > { %v1653_v59 = vmul.f32 %v1651_v38, %v1648_v55 }
 0x8c4   : > { %v1631_v60 = vsub.f32 1.5, %v1630_v56 }
 0x8c5   : > { %v2441_v61 = vpop.eup %2440  ;;  %v1658_v1 = vadd.f32 %v1656_v29, %v1653_v59 }
 0x8c6   : > { %v1632_v0 = vmul.f32 %v2439_v37, %v1631_v60  ;;  %v1638_v3 = vmul.f32 %v2441_v61, %v1606_v41  ;;  %vm1644_vm10 = vweird.f32 %v2441_v61 }
 0x8c7   : > { %v1661_v4 = vpack.c.bf16 %v1658_v1, %v1657_v57  ;;  %vm1645_vm12 = vmor %vm1643_vm11, %vm1644_vm10  ;;  %v2270_v1 = vld [vmem:[%s3397_s7 + $0x10] sm:$0xff] }
 0x8c8   : > { %v1639_v44 = vmul.f32 %v2441_v61, %v1638_v3  ;;  %v1636_v5 = vsel %vm1635_vm9, %v2439_v37, %v1632_v0  ;;  %1930 = vmatpush.bf16.msra.mxu2 %v2270_v1 }
 0x8c9   : > { %2234 = vmatmul.msk.bf16.vlgmr.msra.gmra.mxu1 %vm363_vm0, %v1661_v4  ;;  %v1649_v40 = vmul.f32 %v1636_v5, %v3184_v6 }
 0x8ca   : > { %v1640_v42 = vmul.f32 0.5, %v1639_v44 }
 0x8cb   : > { %v1654_v11 = vmul.f32 %v1651_v38, %v1649_v40 }
 0x8cc   : > { %v1641_v34 = vsub.f32 1.5, %v1640_v42 }
 0x8cd   : > { %v1659_v15 = vadd.f32 %v1656_v29, %v1654_v11 }
 0x8ce   : > { %v1642_v7 = vmul.f32 %v2441_v61, %v1641_v34 }
 0x8d0   : > { %v1646_v9 = vsel %vm1645_vm12, %v2441_v61, %v1642_v7  ;;  %v2269_v7 = vld [vmem:[%s3397_s7 + $0x8] sm:$0xff] }
 0x8d1   : > { %v1650_v10 = vmul.f32 %v1646_v9, %v3191_v12  ;;  %1931 = vmatpush.bf16.msra.mxu2 %v2269_v7 }
 0x8d3   : > { %v1655_v13 = vmul.f32 %v1651_v38, %v1650_v10 }
 0x8d5   : > { %v1660_v16 = vadd.f32 %v1656_v29, %v1655_v13 }
 0x8d7   : > { %v1662_v43 = vpack.c.bf16 %v1660_v16, %v1659_v15 }
 0x8d9   : > { %2235 = vmatmul.msk.bf16.gmra.mxu1 %vm363_vm0, %v1662_v43 }
 0x946   : > { %v1698_v17 = vpop.f32.mrf.mxu1 }
 0x947   : > { %v3213_v18 = vadd.f32 %v2359_v53, %v1698_v17 }
 0x949   : > { %v3216_v21 = vmul.f32 0.70710677, %v3213_v18 }
 0x94b   : > { %v1716_v6 = vmul.f32 %v3216_v21, %v3216_v21 }
 0x94d   : > { %v3220_v22 = vmin.f32 %v1716_v6, 16.0  ;;  %v2268_v6 = vld [vmem:[%s3397_s7] sm:$0xff] }
 0x94e   : > { %v1700_v12 = vpop.f32.mrf.mxu1  ;;  %1932 = vmatpush.bf16.msra.mxu2 %v2268_v6 }
 0x94f   : > { %v1718_v2 = vmul.f32 2.1237322e-06, %v3220_v22  ;;  %v1729_v8 = vmul.f32 3.8918573e-05, %v3220_v22  ;;  %v3224_v23 = vadd.f32 %v2359_v53, %v1700_v12 }
 0x951   : > { %v1719_v24 = vadd.f32 0.00028619796, %v1718_v2  ;;  %v1730_v25 = vadd.f32 0.001143296, %v1729_v8  ;;  %v3227_v26 = vmul.f32 0.70710677, %v3224_v23 }
 0x953   : > { %v1731_v62 = vmul.f32 %v1730_v25, %v3220_v22  ;;  %v1720_v27 = vmul.f32 %v1719_v24, %v3220_v22  ;;  %v1756_v28 = vmul.f32 %v3227_v26, %v3227_v26 }
 0x955   : > { %v1732_v31 = vadd.f32 0.014752088, %v1731_v62  ;;  %v3233_v20 = vmin.f32 %v1756_v28, 16.0  ;;  %v1721_v63 = vadd.f32 0.0036580483, %v1720_v27 }
 0x956   : > { %v1703_v33 = vpop.f32.mrf.mxu1 }
 0x957   : > { %v1733_v35 = vmul.f32 %v1732_v31, %v3220_v22  ;;  %v3236_v30 = vadd.f32 %v2359_v53, %v1703_v33  ;;  %v1758_v36 = vmul.f32 2.1237322e-06, %v3233_v20  ;;  %v1769_v39 = vmul.f32 3.8918573e-05, %v3233_v20 }
 0x958   : > { %v1722_v47 = vmul.f32 %v1721_v63, %v3220_v22 }
 0x959   : > { %v1734_v49 = vadd.f32 0.112945676, %v1733_v35  ;;  %v1759_v37 = vadd.f32 0.00028619796, %v1758_v36  ;;  %v1770_v38 = vadd.f32 0.001143296, %v1769_v39 }
 0x95a   : > { %v3241_v45 = vmul.f32 0.70710677, %v3236_v30  ;;  %v1723_v0 = vadd.f32 0.05243302, %v1722_v47 }
 0x95b   : > { %v1735_v41 = vmul.f32 %v1734_v49, %v3220_v22  ;;  %v1760_v50 = vmul.f32 %v1759_v37, %v3233_v20  ;;  %v1771_v51 = vmul.f32 %v1770_v38, %v3233_v20 }
 0x95c   : > { %v1796_v29 = vmul.f32 %v3241_v45, %v3241_v45  ;;  %v1724_v9 = vmul.f32 %v1723_v0, %v3220_v22 }
 0x95d   : > { %v1736_v54 = vadd.f32 0.4994258, %v1735_v41  ;;  %v1761_v55 = vadd.f32 0.0036580483, %v1760_v50  ;;  %v1772_v56 = vadd.f32 0.014752088, %v1771_v51 }
 0x95e   : > { %v3252_v59 = vmin.f32 %v1796_v29, 16.0  ;;  %v1705_v60 = vpop.f32.mrf.mxu1  ;;  %v1725_v12 = vadd.f32 0.18741608, %v1724_v9 }
 0x95f   : > { %v1737_v61 = vmul.f32 %v1736_v54, %v3220_v22  ;;  %v3255_v57 = vadd.f32 %v2359_v53, %v1705_v60  ;;  %v1762_v3 = vmul.f32 %v1761_v55, %v3233_v20  ;;  %v1773_v4 = vmul.f32 %v1772_v56, %v3233_v20 }
 0x960   : > { %v1798_v44 = vmul.f32 2.1237322e-06, %v3252_v59  ;;  %v1809_v42 = vmul.f32 3.8918573e-05, %v3252_v59  ;;  %v1726_v37 = vmul.f32 %v1725_v12, %v3220_v22 }
 0x961   : > { %v1738_v5 = vadd.f32 1.0, %v1737_v61  ;;  %v3265_v34 = vmul.f32 0.70710677, %v3255_v57  ;;  %v1774_v40 = vadd.f32 0.112945676, %v1773_v4 }
 0x962   : > { %v1763_v10 = vadd.f32 0.05243302, %v1762_v3  ;;  %v1799_v13 = vadd.f32 0.00028619796, %v1798_v44  ;;  %v1810_v15 = vadd.f32 0.001143296, %v1809_v42 }
 0x963   : > { %2442 = vrcp.f32 %v1738_v5  ;;  %v1775_v11 = vmul.f32 %v1774_v40, %v3233_v20  ;;  %v1836_v16 = vmul.f32 %v3265_v34, %v3265_v34  ;;  %v1750_v49 = vand.u32 2147483648, %v1738_v5 }
 0x964   : > { %v1811_v53 = vmul.f32 %v1810_v15, %v3252_v59  ;;  %v1764_v2 = vmul.f32 %v1763_v10, %v3233_v20  ;;  %v1800_v25 = vmul.f32 %v1799_v13, %v3252_v59  ;;  %v1748_v29 = vand.u32 2147483647, %v1738_v5 }
 0x965   : > { %v1776_v43 = vadd.f32 0.4994258, %v1775_v11  ;;  %v3275_v17 = vmin.f32 %v1836_v16, 16.0  ;;  %vm1744_vm14 = vweird.f32 %v1738_v5  ;;  %v1727_v60 = vadd.f32 1.1283791, %v1726_v37 }
 0x966   : > { %v1812_v62 = vadd.f32 0.014752088, %v1811_v53  ;;  %v1765_v38 = vadd.f32 0.18741608, %v1764_v2  ;;  %v1801_v41 = vadd.f32 0.0036580483, %v1800_v25 }
 0x967   : > { %v1777_v8 = vmul.f32 %v1776_v43, %v3233_v20  ;;  %v1838_v27 = vmul.f32 2.1237322e-06, %v3275_v17  ;;  %v1849_v28 = vmul.f32 3.8918573e-05, %v3275_v17  ;;  %v1751_v4 = vor.u32 1.1754944e-38, %v1750_v49 }
 0x968   : > { %v1813_v35 = vmul.f32 %v1812_v62, %v3252_v59  ;;  %v1766_v61 = vmul.f32 %v1765_v38, %v3233_v20  ;;  %v1802_v22 = vmul.f32 %v1801_v41, %v3252_v59  ;;  %vm1749_vm1 = vcmp.eq.f32.partialorder %v1748_v29, 8.507059e+37 }
 0x969   : > { %v2443_v24 = vpop.eup %2442  ;;  %v1778_v33 = vadd.f32 1.0, %v1777_v8  ;;  %v1839_v63 = vadd.f32 0.00028619796, %v1838_v27  ;;  %v1850_v36 = vadd.f32 0.001143296, %v1849_v28  ;;  %v1728_v10 = vmul.f32 %v1727_v60, %v3216_v21 }
 0x96a   : > { %v1740_v31 = vmul.f32 %v2443_v24, %v1738_v5  ;;  %v1814_v46 = vadd.f32 0.112945676, %v1813_v35  ;;  %vm1745_vm13 = vweird.f32 %v2443_v24  ;;  %v1767_v11 = vadd.f32 1.1283791, %v1766_v61 }
 0x96b   : > { %2444 = vrcp.f32 %v1778_v33  ;;  %v1840_v50 = vmul.f32 %v1839_v63, %v3275_v17  ;;  %v1851_v51 = vmul.f32 %v1850_v36, %v3275_v17  ;;  %vm1746_vm15 = vmor %vm1744_vm14, %vm1745_vm13  ;;  %v1803_v20 = vadd.f32 0.05243302, %v1802_v22 }
 0x96c   : > { %v1741_v39 = vsub.f32 1.0, %v1740_v31  ;;  %v1815_v54 = vmul.f32 %v1814_v46, %v3252_v59  ;;  %v1790_v15 = vand.u32 2147483648, %v1778_v33  ;;  %v1788_v2 = vand.u32 2147483647, %v1778_v33 }
 0x96d   : > { %v1852_v56 = vadd.f32 0.014752088, %v1851_v51  ;;  %v1841_v44 = vadd.f32 0.0036580483, %v1840_v50  ;;  %vm1784_vm3 = vweird.f32 %v1778_v33  ;;  %v1768_v21 = vmul.f32 %v1767_v11, %v3227_v26 }
 0x96e   : > { %v1742_v47 = vmul.f32 %v2443_v24, %v1741_v39  ;;  %v1816_v1 = vadd.f32 0.4994258, %v1815_v54  ;;  %v1791_v62 = vor.u32 1.1754944e-38, %v1790_v15  ;;  %vm1789_vm5 = vcmp.eq.f32.partialorder %v1788_v2, 8.507059e+37 }
 0x96f   : > { %v1853_v42 = vmul.f32 %v1852_v56, %v3275_v17  ;;  %v1842_v43 = vmul.f32 %v1841_v44, %v3275_v17  ;;  %v1708_v26 = vmul.f32 0.5, %v3213_v18  ;;  %v1710_v2 = vmul.f32 0.5, %v3236_v30 }
 0x970   : > { %v1743_v55 = vadd.f32 %v2443_v24, %v1742_v47  ;;  %v1817_v9 = vmul.f32 %v1816_v1, %v3252_v59  ;;  %v1709_v47 = vmul.f32 0.5, %v3224_v23 }
 0x971   : > { %v2445_v0 = vpop.eup %2444  ;;  %v1854_v5 = vadd.f32 0.112945676, %v1853_v42  ;;  %v1843_v27 = vadd.f32 0.05243302, %v1842_v43 }
 0x972   : > { %v1747_v3 = vsel %vm1746_vm15, %v2443_v24, %v1743_v55  ;;  %v1780_v40 = vmul.f32 %v2445_v0, %v1778_v33  ;;  %v1818_v16 = vadd.f32 1.0, %v1817_v9  ;;  %vm1785_vm2 = vweird.f32 %v2445_v0 }
 0x973   : > { %v1752_v7 = vsel %vm1749_vm1, %v1751_v4, %v1747_v3  ;;  %v1855_v53 = vmul.f32 %v1854_v5, %v3275_v17  ;;  %v1804_v24 = vmul.f32 %v1803_v20, %v3252_v59  ;;  %vm1786_vm4 = vmor %vm1784_vm3, %vm1785_vm2  ;;  %v1844_v33 = vmul.f32 %v1843_v27, %v3275_v17 }
 0x974   : > { %v1781_v13 = vsub.f32 1.0, %v1780_v40  ;;  %v1753_v6 = vmul.f32 %v1752_v7, %v1728_v10  ;;  %2446 = vrcp.f32 %v1818_v16  ;;  %v1828_v54 = vand.u32 2147483647, %v1818_v16 }
 0x975   : > { %v1856_v25 = vadd.f32 0.4994258, %v1855_v53  ;;  %v1805_v39 = vadd.f32 0.18741608, %v1804_v24  ;;  %v1830_v55 = vand.u32 2147483648, %v1818_v16  ;;  %vm1824_vm8 = vweird.f32 %v1818_v16 }
 0x976   : > { %v1782_v12 = vmul.f32 %v2445_v0, %v1781_v13  ;;  %v2236_v28 = vclamps-f32 %v1753_v6, 1.0  ;;  %v1845_v56 = vadd.f32 0.18741608, %v1844_v33  ;;  %vm1829_vm10 = vcmp.eq.f32.partialorder %v1828_v54, 8.507059e+37 }
 0x977   : > { %v1857_v35 = vmul.f32 %v1856_v25, %v3275_v17  ;;  %v1806_v51 = vmul.f32 %v1805_v39, %v3252_v59  ;;  %v1831_v4 = vor.u32 1.1754944e-38, %v1830_v55  ;;  %v1948_v27 = vperm.slane %v3148_v32, 5 }
 0x978   : > { %v1783_v8 = vadd.f32 %v2445_v0, %v1782_v12  ;;  %v1876_v38 = vadd.f32 1.0, %v2236_v28  ;;  %v1846_v23 = vmul.f32 %v1845_v56, %v3275_v17 }
 0x979   : > { %v1858_v49 = vadd.f32 1.0, %v1857_v35 }
 0x97a   : > { %v1787_v31 = vsel %vm1786_vm4, %v2445_v0, %v1783_v8  ;;  %v2447_v37 = vpop.eup %2446  ;;  %v1880_v60 = vmul.f32 %v1876_v38, %v1708_v26  ;;  %v1807_v0 = vadd.f32 1.1283791, %v1806_v51  ;;  %v1847_v9 = vadd.f32 1.1283791, %v1846_v23 }
 0x97b   : > { %v1792_v63 = vsel %vm1789_vm5, %v1791_v62, %v1787_v31  ;;  %v1820_v46 = vmul.f32 %v2447_v37, %v1818_v16  ;;  %2448 = vrcp.f32 %v1858_v49  ;;  %vm1825_vm6 = vweird.f32 %v2447_v37 }
 0x97c   : > { %v1793_v36 = vmul.f32 %v1792_v63, %v1768_v21  ;;  %vm1826_vm9 = vmor %vm1824_vm8, %vm1825_vm6  ;;  %v1808_v40 = vmul.f32 %v1807_v0, %v3241_v45  ;;  %v1870_v5 = vand.u32 2147483648, %v1858_v49  ;;  %v1868_v13 = vand.u32 2147483647, %v1858_v49 }
 0x97d   : > { %v1821_v29 = vsub.f32 1.0, %v1820_v46  ;;  %vm1864_vm12 = vweird.f32 %v1858_v49  ;;  %v1848_v16 = vmul.f32 %v1847_v9, %v3265_v34  ;;  %v1711_v8 = vmul.f32 0.5, %v3255_v57 }
 0x97e   : > { %v2237_v41 = vclamps-f32 %v1793_v36, 1.0  ;;  %v1871_v15 = vor.u32 1.1754944e-38, %v1870_v5  ;;  %vm1869_vm14 = vcmp.eq.f32.partialorder %v1868_v13, 8.507059e+37 }
 0x97f   : > { %v1822_v22 = vmul.f32 %v2447_v37, %v1821_v29 }
 0x980   : > { %v1877_v50 = vadd.f32 1.0, %v2237_v41 }
 0x981   : > { %v1823_v3 = vadd.f32 %v2447_v37, %v1822_v22  ;;  %v2449_v18 = vpop.eup %2448 }
 0x982   : > { %v1881_v61 = vmul.f32 %v1877_v50, %v1709_v47  ;;  %v1860_v59 = vmul.f32 %v2449_v18, %v1858_v49  ;;  %vm1865_vm11 = vweird.f32 %v2449_v18 }
 0x983   : > { %v1827_v44 = vsel %vm1826_vm9, %v2447_v37, %v1823_v3  ;;  %vm1866_vm13 = vmor %vm1864_vm12, %vm1865_vm11 }
 0x984   : > { %v1884_v1 = vpack.c.bf16 %v1881_v61, %v1880_v60  ;;  %v1832_v42 = vsel %vm1829_vm10, %v1831_v4, %v1827_v44  ;;  %v1861_v7 = vsub.f32 1.0, %v1860_v59 }
 0x985   : > { %v1833_v10 = vmul.f32 %v1832_v42, %v1808_v40 }
 0x986   : > { %2256 = vmatmul.msk.bf16.vlgmr.msra.gmra.mxu2 %vm1918_vm7, %v1884_v1  ;;  %v1862_v11 = vmul.f32 %v2449_v18, %v1861_v7 }
 0x987   : > { %v2238_v17 = vclamps-f32 %v1833_v10, 1.0 }
 0x988   : > { %v1863_v20 = vadd.f32 %v2449_v18, %v1862_v11 }
 0x989   : > { %v1878_v12 = vadd.f32 1.0, %v2238_v17 }
 0x98a   : > { %v1867_v43 = vsel %vm1866_vm13, %v2449_v18, %v1863_v20 }
 0x98b   : > { %v1872_v53 = vsel %vm1869_vm14, %v1871_v15, %v1867_v43  ;;  %v1882_v25 = vmul.f32 %v1878_v12, %v1710_v2  ;;  %v2046_v2 = vperm.slane %v3148_v32, 7 }
 0x98c   : > { %v1873_v6 = vmul.f32 %v1872_v53, %v1848_v16  ;;  %v2041_v53 = vperm.slane %v3148_v32, 6 }
 0x98e   : > { %v2239_v45 = vclamps-f32 %v1873_v6, 1.0 }
 0x990   : > { %v1879_v24 = vadd.f32 1.0, %v2239_v45 }
 0x992   : > { %v1883_v21 = vmul.f32 %v1879_v24, %v1711_v8 }
 0x994   : > { %v1885_v62 = vpack.c.bf16 %v1883_v21, %v1882_v25 }
 0x996   : > { %2257 = vmatmul.msk.bf16.gmra.mxu2 %vm1918_vm7, %v1885_v62 }
 0xa09   : > { %v1934_v28 = vpop.f32.mrf.mxu2 }
 0xa0a   : > { %v1944_v34 = vadd.f32 %v1934_v28, %v3152_v19 }
 0xa0c   : > { %v1949_v31 = vadd.f32 %v1948_v27, %v1944_v34 }
 0xa0e   : > { %v1953_v35 = vsel %vm363_vm0, %v1949_v31, 0.0 }
 0xa0f   : > { %1954 = vadd.xlane.f32.xlu1 %v1953_v35 }
 0xa11   : > { %v1936_v63 = vpop.f32.mrf.mxu2 }
 0xa12   : > { %v1945_v30 = vadd.f32 %v1936_v63, %v3157_v52 }
 0xa14   : > { %v1950_v36 = vadd.f32 %v1948_v27, %v1945_v30 }
 0xa16   : > { %v1956_v57 = vsel %vm363_vm0, %v1950_v36, 0.0 }
 0xa17   : > { %1957 = vadd.xlane.f32.xlu2 %v1956_v57 }
 0xa19   : > { %v1939_v39 = vpop.f32.mrf.mxu2 }
 0xa1a   : > { %v1946_v49 = vadd.f32 %v1939_v39, %v3162_v48 }
 0xa1c   : > { %v1951_v37 = vadd.f32 %v1948_v27, %v1946_v49 }
 0xa1e   : > { %v1959_v33 = vsel %vm363_vm0, %v1951_v37, 0.0 }
 0xa1f   : > { %1960 = vadd.xlane.f32.xlu0 %v1959_v33 }
 0xa21   : > { %v1941_v38 = vpop.f32.mrf.mxu2 }
 0xa22   : > { %v1947_v19 = vadd.f32 %v1941_v38, %v3168_v58 }
 0xa24   : > { %v1952_v41 = vadd.f32 %v1948_v27, %v1947_v19 }
 0xa26   : > { %v1962_v46 = vsel %vm363_vm0, %v1952_v41, 0.0 }
 0xa27   : > { %1963 = vadd.xlane.f32.xlu1 %v1962_v46 }
 0xa82   : > { %v1955_v26 = vpop.xlane.xlu1 %1954 }
 0xa83   : > { %v1965_v52 = vmul.f32 %v1955_v26, %v2812_v14 }
 0xa85   : > { %v1969_v47 = vsub.f32 %v1949_v31, %v1965_v52 }
 0xa87   : > { %v1973_v50 = vmul.f32 %v1969_v47, %v1969_v47 }
 0xa89   : > { %v1977_v51 = vsel %vm363_vm0, %v1973_v50, 0.0 }
 0xa8a   : > { %1978 = vadd.xlane.f32.xlu2 %v1977_v51  ;;  %v1958_v48 = vpop.xlane.xlu2 %1957 }
 0xa8b   : > { %v1966_v29 = vmul.f32 %v1958_v48, %v2812_v14 }
 0xa8d   : > { %v1970_v54 = vsub.f32 %v1950_v36, %v1966_v29 }
 0xa8f   : > { %v1974_v55 = vmul.f32 %v1970_v54, %v1970_v54 }
 0xa91   : > { %v1980_v56 = vsel %vm363_vm0, %v1974_v55, 0.0 }
 0xa92   : > { %1981 = vadd.xlane.f32.xlu0 %v1980_v56  ;;  %v1961_v58 = vpop.xlane.xlu0 %1960 }
 0xa93   : > { %v1967_v60 = vmul.f32 %v1961_v58, %v2812_v14 }
 0xa95   : > { %v3325_v61 = vsub.f32 %v1951_v37, %v1967_v60 }
 0xa97   : > { %v1975_v22 = vmul.f32 %v3325_v61, %v3325_v61 }
 0xa99   : > { %v1983_v1 = vsel %vm363_vm0, %v1975_v22, 0.0 }
 0xa9a   : > { %1984 = vadd.xlane.f32.xlu1 %v1983_v1  ;;  %v1964_v0 = vpop.xlane.xlu1 %1963 }
 0xa9b   : > { %v1968_v3 = vmul.f32 %v1964_v0, %v2812_v14 }
 0xa9d   : > { %v3331_v18 = vsub.f32 %v1952_v41, %v1968_v3 }
 0xa9f   : > { %v1976_v4 = vmul.f32 %v3331_v18, %v3331_v18 }
 0xaa1   : > { %v1986_v23 = vsel %vm363_vm0, %v1976_v4, 0.0 }
 0xaa2   : > { %1987 = vadd.xlane.f32.xlu2 %v1986_v23 }
 0xafd   : > { %v1979_v44 = vpop.xlane.xlu2 %1978 }
 0xafe   : > { %v1989_v59 = vmul.f32 %v1979_v44, %v2812_v14 }
 0xb00   : > { %v1993_v42 = vadd.f32 1e-06, %v1989_v59 }
 0xb02   : > { %2450 = vrsqrt.f32 %v1993_v42  ;;  %vm2003_vm1 = vweird.f32 %v1993_v42 }
 0xb05   : > { %v1982_v40 = vpop.xlane.xlu0 %1981 }
 0xb06   : > { %v1990_v7 = vmul.f32 %v1982_v40, %v2812_v14 }
 0xb08   : > { %v2451_v9 = vpop.eup %2450  ;;  %v1994_v5 = vadd.f32 1e-06, %v1990_v7 }
 0xb09   : > { %v1998_v10 = vmul.f32 %v2451_v9, %v1993_v42  ;;  %vm2004_vm15 = vweird.f32 %v2451_v9 }
 0xb0a   : > { %2452 = vrsqrt.f32 %v1994_v5  ;;  %vm2005_vm2 = vmor %vm2003_vm1, %vm2004_vm15  ;;  %vm2013_vm4 = vweird.f32 %v1994_v5 }
 0xb0b   : > { %v1999_v11 = vmul.f32 %v2451_v9, %v1998_v10 }
 0xb0d   : > { %v2000_v13 = vmul.f32 0.5, %v1999_v11  ;;  %v1985_v43 = vpop.xlane.xlu1 %1984 }
 0xb0e   : > { %v1991_v6 = vmul.f32 %v1985_v43, %v2812_v14 }
 0xb0f   : > { %v2001_v20 = vsub.f32 1.5, %v2000_v13 }
 0xb10   : > { %v2453_v15 = vpop.eup %2452  ;;  %v1995_v24 = vadd.f32 1e-06, %v1991_v6 }
 0xb11   : > { %v2002_v17 = vmul.f32 %v2451_v9, %v2001_v20  ;;  %v2008_v16 = vmul.f32 %v2453_v15, %v1994_v5  ;;  %vm2014_vm3 = vweird.f32 %v2453_v15 }
 0xb12   : > { %2454 = vrsqrt.f32 %v1995_v24  ;;  %vm2015_vm5 = vmor %vm2013_vm4, %vm2014_vm3  ;;  %vm2023_vm7 = vweird.f32 %v1995_v24 }
 0xb13   : > { %v2006_v12 = vsel %vm2005_vm2, %v2451_v9, %v2002_v17  ;;  %v2009_v45 = vmul.f32 %v2453_v15, %v2008_v16 }
 0xb14   : > { %v2037_v8 = vmul.f32 %v2006_v12, %v1969_v47 }
 0xb15   : > { %v2010_v25 = vmul.f32 0.5, %v2009_v45  ;;  %v1988_v34 = vpop.xlane.xlu2 %1987 }
 0xb16   : > { %v2042_v21 = vmul.f32 %v2041_v53, %v2037_v8  ;;  %v1992_v32 = vmul.f32 %v1988_v34, %v2812_v14 }
 0xb17   : > { %v2011_v62 = vsub.f32 1.5, %v2010_v25 }
 0xb18   : > { %v2047_v27 = vadd.f32 %v2046_v2, %v2042_v21  ;;  %v2455_v35 = vpop.eup %2454  ;;  %v1996_v30 = vadd.f32 1e-06, %v1992_v32 }
 0xb19   : > { %v2012_v28 = vmul.f32 %v2453_v15, %v2011_v62  ;;  %v2018_v36 = vmul.f32 %v2455_v35, %v1995_v24  ;;  %vm2024_vm6 = vweird.f32 %v2455_v35 }
 0xb1a   : > { %2051 = vst.msk [vmem:[%s3343_s24] sm:$0xff] %vm363_vm0, %v2047_v27  ;;  %2456 = vrsqrt.f32 %v1996_v30  ;;  %vm2025_vm8 = vmor %vm2023_vm7, %vm2024_vm6  ;;  %vm2033_vm10 = vweird.f32 %v1996_v30 }
 0xb1b   : > { %v2016_v31 = vsel %vm2015_vm5, %v2453_v15, %v2012_v28  ;;  %v2019_v39 = vmul.f32 %v2455_v35, %v2018_v36 }
 0xb1c   : > { %v2038_v63 = vmul.f32 %v2016_v31, %v1970_v54 }
 0xb1d   : > { %v2020_v37 = vmul.f32 0.5, %v2019_v39 }
 0xb1e   : > { %v2043_v57 = vmul.f32 %v2041_v53, %v2038_v63 }
 0xb1f   : > { %v2021_v33 = vsub.f32 1.5, %v2020_v37 }
 0xb20   : > { %v2048_v49 = vadd.f32 %v2046_v2, %v2043_v57  ;;  %v2457_v38 = vpop.eup %2456 }
 0xb21   : > { %v2022_v19 = vmul.f32 %v2455_v35, %v2021_v33  ;;  %v2028_v14 = vmul.f32 %v2457_v38, %v1996_v30  ;;  %vm2034_vm9 = vweird.f32 %v2457_v38 }
 0xb22   : > { %2052 = vst.msk [vmem:[%s3343_s24 + $0x8] sm:$0xff] %vm363_vm0, %v2048_v49  ;;  %vm2035_vm11 = vmor %vm2033_vm10, %vm2034_vm9 }
 0xb23   : > { %v2026_v41 = vsel %vm2025_vm8, %v2455_v35, %v2022_v19  ;;  %v2029_v46 = vmul.f32 %v2457_v38, %v2028_v14 }
 0xb24   : > { %v2039_v26 = vmul.f32 %v2026_v41, %v3325_v61 }
 0xb25   : > { %v2030_v52 = vmul.f32 0.5, %v2029_v46 }
 0xb26   : > { %v2044_v47 = vmul.f32 %v2041_v53, %v2039_v26 }
 0xb27   : > { %v2031_v50 = vsub.f32 1.5, %v2030_v52 }
 0xb28   : > { %v2049_v51 = vadd.f32 %v2046_v2, %v2044_v47 }
 0xb29   : > { %v2032_v48 = vmul.f32 %v2457_v38, %v2031_v50 }
 0xb2a   : > { %2053 = vst.msk [vmem:[%s3343_s24 + $0x10] sm:$0xff] %vm363_vm0, %v2049_v51 }
 0xb2b   : > { %v2036_v29 = vsel %vm2035_vm11, %v2457_v38, %v2032_v48 }
 0xb2c   : > { %v2040_v54 = vmul.f32 %v2036_v29, %v3331_v18 }
 0xb2e   : > { %v2045_v55 = vmul.f32 %v2041_v53, %v2040_v54 }
 0xb30   : > { %v2050_v56 = vadd.f32 %v2046_v2, %v2045_v55 }
 0xb32   : > { %2054 = vst.msk [vmem:[%s3343_s24 + $0x18] sm:$0xff] %vm363_vm0, %v2050_v56 }
 0xb33   : > { %2580 = shalt.err (!%p2577_p8)
}
 0xb34   : > { %s2641_s23 = smov 128   ;;  %s2642_s12 = smov 8  }
 0xb35   : > { %2285 = dma.vmem_to_hbm [thread:$0]  (%p2740_p11), %s2069_s26, 512, %s2071_s9, %s2056_s11, %s2641_s23, %s2641_s23, %s2642_s12  }
 0xb36 PF: > { %s2085_s15 = sand.u32 1, %s2611_s27   ;;  %p3418_p9 = scmp.ge.s32.totalorder %s2623_s30, 2 }
 0xb37   : > { %s2086_s24 = scalar_lea.sflag [#allocation4], %s2085_s15 }
 0xb38   : > { %p2299_p10 = pnand %p3418_p9, %p2744_p12 }
 0xb3a   : > { %p2300_p1 = pneg %p2299_p10 }
 0xb3c   : > { %2606 = dma.done.wait (%p2300_p1), %s2086_s24, 512  }
 0xb3d   : > { %2608 = vsyncadd (%p2300_p1), %s2086_s24, 4294966784  ;;  %s3419_s30 = sld [smem:[#allocation12_spill]]  ;;  %s3421_s27 = smov %s2615_s28 }
 0xb3e   : > { %s3420_s25 = sld [smem:[#allocation13_spill]]  ;;  %s3422_s28 = smov %s2619_s29 }
 0xb43   : > { %p22_p2 = scmp.ge.s32.totalorder %s3419_s30, 4  }
 0xb44   : > { %s3423_s29 = smov %s3420_s25 }
 0xb45   :  { %24 = sbr.rel (!%p22_p2) target bundleno = 9 (0x9), region = 105 }
 0xb4a   :  { %2092 = vsyncpa [#allocation3], 1 }
 0xb4b   :  { %2094 = vsyncpa [#allocation3 + $0x1], 1 }
 0xb4c   :  { %2095 = vsyncpa [#allocation6], 1 }
 0xb4d   :  { %2096 = vsyncpa [#allocation4], 1 }
 0xb4e   :  { %2098 = vsyncpa [#allocation4 + $0x1], 1 }

</bundles_post_ra>
